<compile_context>
chip_gen: v7x
topology: tpu7x:2x2x1
jax: 0.10.0
libtpu: 0.0.40
codegen_flags: <defaults>
</compile_context>

<pallas_src>
import functools

import jax
import jax.numpy as jnp
from jax import lax
from jax.experimental import pallas as pl
from jax.experimental.pallas import tpu as pltpu


BP = 8  # per-timestep batch rows padded to the f32 sublane tile


def _round_up(x, m):
    return (x + m - 1) // m * m


# ----------------------------- Pallas kernel ------------------------------ #
def lstm_fc_kernel(x_ref,      # (T*BP, I+1)  time-major rows, last col = 1.0
                   slab_ref,   # (R, 8H)      packed weights/biases
                   out_ref,    # (BP, 4H)     padded FC output (lane-dense)
                   *, T, H, I, r_big, r_bias, r_fc):
    H4 = 4 * H

    # ---- static slab carve-up (all windows sublane/lane tile-aligned) ----- #
    w_ih0 = slab_ref[0:I + 1, 0:H4]              # (I+1, 4H); row I holds b0
    w_big = slab_ref[r_big:r_big + 2 * H, :]     # (2H, 8H): [[Whh0, Wih1],[0, Whh1]]
    b1 = slab_ref[r_bias:r_bias + 1, 0:H4]       # (1, 4H)
    fc_b = slab_ref[r_bias:r_bias + 1, H4:2 * H4]  # (1, 4H) zero-padded fc bias
    fc_w = slab_ref[r_fc:r_fc + H, 0:H4]         # (H, 4H) zero-padded fc weight

    b1b = jnp.broadcast_to(b1, (BP, H4))         # hoisted broadcast

    # ---- batched layer-0 input projection for all T steps (bias folded via
    #      the ones column of x): one MXU matmul, off the recurrent chain. --- #
    xp0 = jnp.dot(x_ref[...], w_ih0,
                  preferred_element_type=jnp.float32)          # (T*BP, 4H)

    def cell(gates, c):
        # g-gate columns of every weight/bias were pre-scaled by 2 in the
        # wrapper: a single sigmoid over the full 4H width serves all gates,
        # and tanh(g) is recovered exactly as 2*sigmoid(2g) - 1.
        s = jax.nn.sigmoid(gates)
        i = s[:, 0 * H:1 * H]
        f = s[:, 1 * H:2 * H]
        g = 2.0 * s[:, 2 * H:3 * H] - 1.0
        o = s[:, 3 * H:4 * H]
        c_new = f * c + i * g
        h_new = o * jnp.tanh(c_new)
        return h_new, c_new

    zeros = jnp.zeros((BP, H), jnp.float32)
    h0, c0 = zeros, zeros        # layer-0 carry
    h1, c1 = zeros, zeros        # layer-1 carry

    # Wavefront over the two layers, fully unrolled (T is small & static):
    # iteration t runs layer-0 step t (t < T) and layer-1 step t-1 (t >= 1)
    # with ONE merged matmul against the step-invariant (2H, 8H) RHS.
    for t in range(T + 1):
        hcat = jnp.concatenate([h0, h1], axis=1)        # [h0_{t-1} | h1_{t-2}]
        g_big = jnp.dot(hcat, w_big,
                        preferred_element_type=jnp.float32)    # (BP, 8H)
        if t < T:   # layer-0 step t
            gates0 = g_big[:, 0:H4] + xp0[t * BP:(t + 1) * BP, :]
            h0, c0 = cell(gates0, c0)
        if t >= 1:  # layer-1 step t-1 (uses start-of-iteration carries)
            gates1 = g_big[:, H4:2 * H4] + b1b
            h1, c1 = cell(gates1, c1)

    # Final linear head on h1 == out[:, -1, :]; output padded to 4H=128 lanes
    # so the store is a single unmasked, lane-dense vst.
    out_ref[...] = (jnp.dot(h1, fc_w, preferred_element_type=jnp.float32)
                    + fc_b)


# ------------------------------- wrapper ----------------------------------- #
def stock_predictor_forward(x_btI, params):
    """x_btI: (B, T, I) float32 (PyTorch batch_first layout)."""
    B, T, I = x_btI.shape
    H = params["w_hh0"].shape[1]          # PyTorch weights are (4H, H)
    O = params["fc_w"].shape[0]
    H4 = 4 * H
    assert B <= BP and O <= H4

    # ---- input: time-major, batch padded to 8 rows (zeros), plus a trailing
    #      ones column so the layer-0 bias folds into the batched matmul. ---- #
    x_tb = jnp.transpose(x_btI, (1, 0, 2)).astype(jnp.float32)     # (T, B, I)
    x_pad = jnp.zeros((T, BP, I + 1), jnp.float32)
    x_pad = x_pad.at[:, :B, :I].set(x_tb)
    x_pad = x_pad.at[:, :B, I].set(1.0)
    x2d = x_pad.reshape(T * BP, I + 1)                             # (T*BP, I+1)

    # ---- weights: transpose to (in, 4H), pre-scale g-gate columns by 2,
    #      pre-sum biases, build merged recurrent RHS, pack one slab. ------- #
    gscale = jnp.ones((H4,), jnp.float32).at[2 * H:3 * H].set(2.0)

    w_ih0 = params["w_ih0"].T.astype(jnp.float32) * gscale          # (I, 4H)
    w_hh0 = params["w_hh0"].T.astype(jnp.float32) * gscale          # (H, 4H)
    w_ih1 = params["w_ih1"].T.astype(jnp.float32) * gscale          # (H, 4H)
    w_hh1 = params["w_hh1"].T.astype(jnp.float32) * gscale          # (H, 4H)
    b0 = (params["b_ih0"] + params["b_hh0"]).astype(jnp.float32) * gscale
    b1 = (params["b_ih1"] + params["b_hh1"]).astype(jnp.float32) * gscale

    # Merged recurrent RHS [[W_hh0, W_ih1], [0, W_hh1]]  -> (2H, 8H).
    # The zero block is exact zeros (correctness requirement).
    w_big = jnp.zeros((2 * H, 2 * H4), jnp.float32)
    w_big = w_big.at[0:H, 0:H4].set(w_hh0)
    w_big = w_big.at[0:H, H4:2 * H4].set(w_ih1)
    w_big = w_big.at[H:2 * H, H4:2 * H4].set(w_hh1)

    # Packed slab: 8-aligned row offsets so every in-kernel slice is aligned.
    r_big = _round_up(I + 1, 8)
    r_bias = _round_up(r_big + 2 * H, 8)
    r_fc = _round_up(r_bias + 1, 8)
    rows = _round_up(r_fc + H, 8)

    slab = jnp.zeros((rows, 2 * H4), jnp.float32)
    slab = slab.at[0:I, 0:H4].set(w_ih0)
    slab = slab.at[I, 0:H4].set(b0)                                  # folded b0
    slab = slab.at[r_big:r_big + 2 * H, :].set(w_big)
    slab = slab.at[r_bias, 0:H4].set(b1)
    slab = slab.at[r_bias, H4:H4 + O].set(params["fc_b"].astype(jnp.float32))
    slab = slab.at[r_fc:r_fc + H, 0:O].set(params["fc_w"].T.astype(jnp.float32))

    kernel = functools.partial(lstm_fc_kernel, T=T, H=H, I=I,
                               r_big=r_big, r_bias=r_bias, r_fc=r_fc)

    # No grid: single-shot kernel, plain whole-array VMEM refs (no trivial
    # 1-point pipeline / double-buffering machinery).
    vmem = pl.BlockSpec(memory_space=pltpu.MemorySpace.VMEM)
    out_pad = pl.pallas_call(
        kernel,
        out_shape=jax.ShapeDtypeStruct((BP, H4), jnp.float32),
        in_specs=[vmem, vmem],
        out_specs=vmem,
    )(x2d, slab)
    return out_pad[:B, :O]


# --------------------------- pure-JAX reference ---------------------------- #
def reference_forward(x_btI, params):
    B, T, I = x_btI.shape
    H = params["w_hh0"].shape[1]

    def lstm_layer(seq, w_ih, w_hh, b_ih, b_hh):   # seq: (T, B, in)
        def step(carry, x_t):
            h, c = carry
            gates = x_t @ w_ih.T + h @ w_hh.T + b_ih + b_hh
            i = jax.nn.sigmoid(gates[:, 0 * H:1 * H])
            f = jax.nn.sigmoid(gates[:, 1 * H:2 * H])
            g = jnp.tanh(gates[:, 2 * H:3 * H])
            o = jax.nn.sigmoid(gates[:, 3 * H:4 * H])
            c = f * c + i * g
            h = o * jnp.tanh(c)
            return (h, c), h
        init = (jnp.zeros((B, H), jnp.float32), jnp.zeros((B, H), jnp.float32))
        _, hs = lax.scan(step, init, seq)
        return hs                                   # (T, B, H)

    seq = jnp.transpose(x_btI, (1, 0, 2))
    seq = lstm_layer(seq, params["w_ih0"], params["w_hh0"],
                     params["b_ih0"], params["b_hh0"])
    seq = lstm_layer(seq, params["w_ih1"], params["w_hh1"],
                     params["b_ih1"], params["b_hh1"])
    h_last = seq[-1]                                # (B, H)
    return h_last @ params["fc_w"].T + params["fc_b"]


# --------------------------------- main ------------------------------------ #
if __name__ == "__main__":
    # Model config (matches the nn.Module constructor).
    input_size, hidden_size, num_layers, output_size = 4, 32, 2, 1
    B, T = 2, 8

    key = jax.random.PRNGKey(0)
    ks = jax.random.split(key, 12)
    s = 1.0 / jnp.sqrt(hidden_size)   # PyTorch-style uniform(-1/sqrt(H), 1/sqrt(H))
    u = lambda k, shape: jax.random.uniform(k, shape, jnp.float32, -s, s)

    params = {
        "w_ih0": u(ks[0], (4 * hidden_size, input_size)),
        "w_hh0": u(ks[1], (4 * hidden_size, hidden_size)),
        "b_ih0": u(ks[2], (4 * hidden_size,)),
        "b_hh0": u(ks[3], (4 * hidden_size,)),
        "w_ih1": u(ks[4], (4 * hidden_size, hidden_size)),
        "w_hh1": u(ks[5], (4 * hidden_size, hidden_size)),
        "b_ih1": u(ks[6], (4 * hidden_size,)),
        "b_hh1": u(ks[7], (4 * hidden_size,)),
        "fc_w":  u(ks[8], (output_size, hidden_size)),
        "fc_b":  u(ks[9], (output_size,)),
    }

    x = jax.random.normal(ks[10], (B, T, input_size), jnp.float32)

    out = stock_predictor_forward(x, params)
    out = jax.block_until_ready(out)

    ref = reference_forward(x, params)
    assert out.shape == (B, output_size)
    assert jnp.allclose(out, ref, atol=1e-4, rtol=1e-4), (out, ref)

    print("KERNEL_OK")
</pallas_src>

<mosaic_0001>
module attributes {stable_mosaic.version = 11 : i64} {
  func.func @lstm_fc_kernel(%arg0: memref<64x5xf32, #tpu.memory_space<vmem>>, %arg1: memref<112x256xf32, #tpu.memory_space<vmem>>, %arg2: memref<8x128xf32, #tpu.memory_space<vmem>>) attributes {dimension_semantics = [], scalar_prefetch = 0 : i64, scratch_operands = 0 : i64, tpu.core_type = #tpu.core_type<tc>} {
    %c0 = arith.constant 0 : index
    %c0_0 = arith.constant 0 : index
    %0 = vector.load %arg1[%c0, %c0_0] : memref<112x256xf32, #tpu.memory_space<vmem>>, vector<5x128xf32>
    %c8 = arith.constant 8 : index
    %c0_1 = arith.constant 0 : index
    %1 = vector.load %arg1[%c8, %c0_1] : memref<112x256xf32, #tpu.memory_space<vmem>>, vector<64x256xf32>
    %c72 = arith.constant 72 : index
    %c0_2 = arith.constant 0 : index
    %2 = vector.load %arg1[%c72, %c0_2] : memref<112x256xf32, #tpu.memory_space<vmem>>, vector<1x128xf32>
    %c72_3 = arith.constant 72 : index
    %c128 = arith.constant 128 : index
    %3 = vector.load %arg1[%c72_3, %c128] : memref<112x256xf32, #tpu.memory_space<vmem>>, vector<1x128xf32>
    %c80 = arith.constant 80 : index
    %c0_4 = arith.constant 0 : index
    %4 = vector.load %arg1[%c80, %c0_4] : memref<112x256xf32, #tpu.memory_space<vmem>>, vector<32x128xf32>
    %5 = vector.shape_cast %2 : vector<1x128xf32> to vector<1x128xf32>
    %6 = vector.broadcast %5 : vector<1x128xf32> to vector<8x128xf32>
    %c0_5 = arith.constant 0 : index
    %c0_6 = arith.constant 0 : index
    %7 = vector.load %arg0[%c0_5, %c0_6] : memref<64x5xf32, #tpu.memory_space<vmem>>, vector<64x5xf32>
    %cst = arith.constant dense<0.000000e+00> : vector<64x128xf32>
    %8 = tpu.matmul %7, %0, %cst {dimension_numbers = #tpu.dot_dimension_numbers<[1], [0], [0], [1], [0, 0, 1, 1], [], []>} : vector<64x5xf32>, vector<5x128xf32>, vector<64x128xf32> -> vector<64x128xf32>
    %cst_7 = arith.constant 0.000000e+00 : f32
    %9 = vector.broadcast %cst_7 : f32 to vector<8x32xf32>
    %10 = tpu.concatenate %9, %9 in 1 : vector<8x32xf32>, vector<8x32xf32> -> vector<8x64xf32>
    %cst_8 = arith.constant dense<0.000000e+00> : vector<8x256xf32>
    %11 = tpu.matmul %10, %1, %cst_8 {dimension_numbers = #tpu.dot_dimension_numbers<[1], [0], [0], [1], [0, 0, 1, 1], [], []>} : vector<8x64xf32>, vector<64x256xf32>, vector<8x256xf32> -> vector<8x256xf32>
    %12 = vector.extract_strided_slice %11 {offsets = [0, 0], sizes = [8, 128], strides = [1, 1]} : vector<8x256xf32> to vector<8x128xf32>
    %13 = vector.extract_strided_slice %8 {offsets = [0, 0], sizes = [8, 128], strides = [1, 1]} : vector<64x128xf32> to vector<8x128xf32>
    %14 = arith.addf %12, %13 : vector<8x128xf32>
    %15 = arith.negf %14 : vector<8x128xf32>
    %16 = math.exp %15 : vector<8x128xf32>
    %cst_9 = arith.constant 1.000000e+00 : f32
    %17 = vector.broadcast %cst_9 : f32 to vector<8x128xf32>
    %18 = arith.addf %17, %16 : vector<8x128xf32>
    %19 = arith.divf %17, %18 : vector<8x128xf32>
    %20 = vector.extract_strided_slice %19 {offsets = [0, 0], sizes = [8, 32], strides = [1, 1]} : vector<8x128xf32> to vector<8x32xf32>
    %21 = vector.extract_strided_slice %19 {offsets = [0, 32], sizes = [8, 32], strides = [1, 1]} : vector<8x128xf32> to vector<8x32xf32>
    %22 = vector.extract_strided_slice %19 {offsets = [0, 64], sizes = [8, 32], strides = [1, 1]} : vector<8x128xf32> to vector<8x32xf32>
    %cst_10 = arith.constant 2.000000e+00 : f32
    %23 = vector.broadcast %cst_10 : f32 to vector<8x32xf32>
    %24 = arith.mulf %23, %22 : vector<8x32xf32>
    %cst_11 = arith.constant 1.000000e+00 : f32
    %25 = vector.broadcast %cst_11 : f32 to vector<8x32xf32>
    %26 = arith.subf %24, %25 : vector<8x32xf32>
    %27 = vector.extract_strided_slice %19 {offsets = [0, 96], sizes = [8, 32], strides = [1, 1]} : vector<8x128xf32> to vector<8x32xf32>
    %28 = arith.mulf %21, %9 : vector<8x32xf32>
    %29 = arith.mulf %20, %26 : vector<8x32xf32>
    %30 = arith.addf %28, %29 : vector<8x32xf32>
    %31 = math.tanh %30 : vector<8x32xf32>
    %32 = arith.mulf %27, %31 : vector<8x32xf32>
    %33 = tpu.concatenate %32, %9 in 1 : vector<8x32xf32>, vector<8x32xf32> -> vector<8x64xf32>
    %cst_12 = arith.constant dense<0.000000e+00> : vector<8x256xf32>
    %34 = tpu.matmul %33, %1, %cst_12 {dimension_numbers = #tpu.dot_dimension_numbers<[1], [0], [0], [1], [0, 0, 1, 1], [], []>} : vector<8x64xf32>, vector<64x256xf32>, vector<8x256xf32> -> vector<8x256xf32>
    %35 = vector.extract_strided_slice %34 {offsets = [0, 0], sizes = [8, 128], strides = [1, 1]} : vector<8x256xf32> to vector<8x128xf32>
    %36 = vector.extract_strided_slice %8 {offsets = [8, 0], sizes = [8, 128], strides = [1, 1]} : vector<64x128xf32> to vector<8x128xf32>
    %37 = arith.addf %35, %36 : vector<8x128xf32>
    %38 = arith.negf %37 : vector<8x128xf32>
    %39 = math.exp %38 : vector<8x128xf32>
    %cst_13 = arith.constant 1.000000e+00 : f32
    %40 = vector.broadcast %cst_13 : f32 to vector<8x128xf32>
    %41 = arith.addf %40, %39 : vector<8x128xf32>
    %42 = arith.divf %40, %41 : vector<8x128xf32>
    %43 = vector.extract_strided_slice %42 {offsets = [0, 0], sizes = [8, 32], strides = [1, 1]} : vector<8x128xf32> to vector<8x32xf32>
    %44 = vector.extract_strided_slice %42 {offsets = [0, 32], sizes = [8, 32], strides = [1, 1]} : vector<8x128xf32> to vector<8x32xf32>
    %45 = vector.extract_strided_slice %42 {offsets = [0, 64], sizes = [8, 32], strides = [1, 1]} : vector<8x128xf32> to vector<8x32xf32>
    %cst_14 = arith.constant 2.000000e+00 : f32
    %46 = vector.broadcast %cst_14 : f32 to vector<8x32xf32>
    %47 = arith.mulf %46, %45 : vector<8x32xf32>
    %cst_15 = arith.constant 1.000000e+00 : f32
    %48 = vector.broadcast %cst_15 : f32 to vector<8x32xf32>
    %49 = arith.subf %47, %48 : vector<8x32xf32>
    %50 = vector.extract_strided_slice %42 {offsets = [0, 96], sizes = [8, 32], strides = [1, 1]} : vector<8x128xf32> to vector<8x32xf32>
    %51 = arith.mulf %44, %30 : vector<8x32xf32>
    %52 = arith.mulf %43, %49 : vector<8x32xf32>
    %53 = arith.addf %51, %52 : vector<8x32xf32>
    %54 = math.tanh %53 : vector<8x32xf32>
    %55 = arith.mulf %50, %54 : vector<8x32xf32>
    %56 = vector.extract_strided_slice %34 {offsets = [0, 128], sizes = [8, 128], strides = [1, 1]} : vector<8x256xf32> to vector<8x128xf32>
    %57 = arith.addf %56, %6 : vector<8x128xf32>
    %58 = arith.negf %57 : vector<8x128xf32>
    %59 = math.exp %58 : vector<8x128xf32>
    %cst_16 = arith.constant 1.000000e+00 : f32
    %60 = vector.broadcast %cst_16 : f32 to vector<8x128xf32>
    %61 = arith.addf %60, %59 : vector<8x128xf32>
    %62 = arith.divf %60, %61 : vector<8x128xf32>
    %63 = vector.extract_strided_slice %62 {offsets = [0, 0], sizes = [8, 32], strides = [1, 1]} : vector<8x128xf32> to vector<8x32xf32>
    %64 = vector.extract_strided_slice %62 {offsets = [0, 32], sizes = [8, 32], strides = [1, 1]} : vector<8x128xf32> to vector<8x32xf32>
    %65 = vector.extract_strided_slice %62 {offsets = [0, 64], sizes = [8, 32], strides = [1, 1]} : vector<8x128xf32> to vector<8x32xf32>
    %cst_17 = arith.constant 2.000000e+00 : f32
    %66 = vector.broadcast %cst_17 : f32 to vector<8x32xf32>
    %67 = arith.mulf %66, %65 : vector<8x32xf32>
    %cst_18 = arith.constant 1.000000e+00 : f32
    %68 = vector.broadcast %cst_18 : f32 to vector<8x32xf32>
    %69 = arith.subf %67, %68 : vector<8x32xf32>
    %70 = vector.extract_strided_slice %62 {offsets = [0, 96], sizes = [8, 32], strides = [1, 1]} : vector<8x128xf32> to vector<8x32xf32>
    %71 = arith.mulf %64, %9 : vector<8x32xf32>
    %72 = arith.mulf %63, %69 : vector<8x32xf32>
    %73 = arith.addf %71, %72 : vector<8x32xf32>
    %74 = math.tanh %73 : vector<8x32xf32>
    %75 = arith.mulf %70, %74 : vector<8x32xf32>
    %76 = tpu.concatenate %55, %75 in 1 : vector<8x32xf32>, vector<8x32xf32> -> vector<8x64xf32>
    %cst_19 = arith.constant dense<0.000000e+00> : vector<8x256xf32>
    %77 = tpu.matmul %76, %1, %cst_19 {dimension_numbers = #tpu.dot_dimension_numbers<[1], [0], [0], [1], [0, 0, 1, 1], [], []>} : vector<8x64xf32>, vector<64x256xf32>, vector<8x256xf32> -> vector<8x256xf32>
    %78 = vector.extract_strided_slice %77 {offsets = [0, 0], sizes = [8, 128], strides = [1, 1]} : vector<8x256xf32> to vector<8x128xf32>
    %79 = vector.extract_strided_slice %8 {offsets = [16, 0], sizes = [8, 128], strides = [1, 1]} : vector<64x128xf32> to vector<8x128xf32>
    %80 = arith.addf %78, %79 : vector<8x128xf32>
    %81 = arith.negf %80 : vector<8x128xf32>
    %82 = math.exp %81 : vector<8x128xf32>
    %cst_20 = arith.constant 1.000000e+00 : f32
    %83 = vector.broadcast %cst_20 : f32 to vector<8x128xf32>
    %84 = arith.addf %83, %82 : vector<8x128xf32>
    %85 = arith.divf %83, %84 : vector<8x128xf32>
    %86 = vector.extract_strided_slice %85 {offsets = [0, 0], sizes = [8, 32], strides = [1, 1]} : vector<8x128xf32> to vector<8x32xf32>
    %87 = vector.extract_strided_slice %85 {offsets = [0, 32], sizes = [8, 32], strides = [1, 1]} : vector<8x128xf32> to vector<8x32xf32>
    %88 = vector.extract_strided_slice %85 {offsets = [0, 64], sizes = [8, 32], strides = [1, 1]} : vector<8x128xf32> to vector<8x32xf32>
    %cst_21 = arith.constant 2.000000e+00 : f32
    %89 = vector.broadcast %cst_21 : f32 to vector<8x32xf32>
    %90 = arith.mulf %89, %88 : vector<8x32xf32>
    %cst_22 = arith.constant 1.000000e+00 : f32
    %91 = vector.broadcast %cst_22 : f32 to vector<8x32xf32>
    %92 = arith.subf %90, %91 : vector<8x32xf32>
    %93 = vector.extract_strided_slice %85 {offsets = [0, 96], sizes = [8, 32], strides = [1, 1]} : vector<8x128xf32> to vector<8x32xf32>
    %94 = arith.mulf %87, %53 : vector<8x32xf32>
    %95 = arith.mulf %86, %92 : vector<8x32xf32>
    %96 = arith.addf %94, %95 : vector<8x32xf32>
    %97 = math.tanh %96 : vector<8x32xf32>
    %98 = arith.mulf %93, %97 : vector<8x32xf32>
    %99 = vector.extract_strided_slice %77 {offsets = [0, 128], sizes = [8, 128], strides = [1, 1]} : vector<8x256xf32> to vector<8x128xf32>
    %100 = arith.addf %99, %6 : vector<8x128xf32>
    %101 = arith.negf %100 : vector<8x128xf32>
    %102 = math.exp %101 : vector<8x128xf32>
    %cst_23 = arith.constant 1.000000e+00 : f32
    %103 = vector.broadcast %cst_23 : f32 to vector<8x128xf32>
    %104 = arith.addf %103, %102 : vector<8x128xf32>
    %105 = arith.divf %103, %104 : vector<8x128xf32>
    %106 = vector.extract_strided_slice %105 {offsets = [0, 0], sizes = [8, 32], strides = [1, 1]} : vector<8x128xf32> to vector<8x32xf32>
    %107 = vector.extract_strided_slice %105 {offsets = [0, 32], sizes = [8, 32], strides = [1, 1]} : vector<8x128xf32> to vector<8x32xf32>
    %108 = vector.extract_strided_slice %105 {offsets = [0, 64], sizes = [8, 32], strides = [1, 1]} : vector<8x128xf32> to vector<8x32xf32>
    %cst_24 = arith.constant 2.000000e+00 : f32
    %109 = vector.broadcast %cst_24 : f32 to vector<8x32xf32>
    %110 = arith.mulf %109, %108 : vector<8x32xf32>
    %cst_25 = arith.constant 1.000000e+00 : f32
    %111 = vector.broadcast %cst_25 : f32 to vector<8x32xf32>
    %112 = arith.subf %110, %111 : vector<8x32xf32>
    %113 = vector.extract_strided_slice %105 {offsets = [0, 96], sizes = [8, 32], strides = [1, 1]} : vector<8x128xf32> to vector<8x32xf32>
    %114 = arith.mulf %107, %73 : vector<8x32xf32>
    %115 = arith.mulf %106, %112 : vector<8x32xf32>
    %116 = arith.addf %114, %115 : vector<8x32xf32>
    %117 = math.tanh %116 : vector<8x32xf32>
    %118 = arith.mulf %113, %117 : vector<8x32xf32>
    %119 = tpu.concatenate %98, %118 in 1 : vector<8x32xf32>, vector<8x32xf32> -> vector<8x64xf32>
    %cst_26 = arith.constant dense<0.000000e+00> : vector<8x256xf32>
    %120 = tpu.matmul %119, %1, %cst_26 {dimension_numbers = #tpu.dot_dimension_numbers<[1], [0], [0], [1], [0, 0, 1, 1], [], []>} : vector<8x64xf32>, vector<64x256xf32>, vector<8x256xf32> -> vector<8x256xf32>
    %121 = vector.extract_strided_slice %120 {offsets = [0, 0], sizes = [8, 128], strides = [1, 1]} : vector<8x256xf32> to vector<8x128xf32>
    %122 = vector.extract_strided_slice %8 {offsets = [24, 0], sizes = [8, 128], strides = [1, 1]} : vector<64x128xf32> to vector<8x128xf32>
    %123 = arith.addf %121, %122 : vector<8x128xf32>
    %124 = arith.negf %123 : vector<8x128xf32>
    %125 = math.exp %124 : vector<8x128xf32>
    %cst_27 = arith.constant 1.000000e+00 : f32
    %126 = vector.broadcast %cst_27 : f32 to vector<8x128xf32>
    %127 = arith.addf %126, %125 : vector<8x128xf32>
    %128 = arith.divf %126, %127 : vector<8x128xf32>
    %129 = vector.extract_strided_slice %128 {offsets = [0, 0], sizes = [8, 32], strides = [1, 1]} : vector<8x128xf32> to vector<8x32xf32>
    %130 = vector.extract_strided_slice %128 {offsets = [0, 32], sizes = [8, 32], strides = [1, 1]} : vector<8x128xf32> to vector<8x32xf32>
    %131 = vector.extract_strided_slice %128 {offsets = [0, 64], sizes = [8, 32], strides = [1, 1]} : vector<8x128xf32> to vector<8x32xf32>
    %cst_28 = arith.constant 2.000000e+00 : f32
    %132 = vector.broadcast %cst_28 : f32 to vector<8x32xf32>
    %133 = arith.mulf %132, %131 : vector<8x32xf32>
    %cst_29 = arith.constant 1.000000e+00 : f32
    %134 = vector.broadcast %cst_29 : f32 to vector<8x32xf32>
    %135 = arith.subf %133, %134 : vector<8x32xf32>
    %136 = vector.extract_strided_slice %128 {offsets = [0, 96], sizes = [8, 32], strides = [1, 1]} : vector<8x128xf32> to vector<8x32xf32>
    %137 = arith.mulf %130, %96 : vector<8x32xf32>
    %138 = arith.mulf %129, %135 : vector<8x32xf32>
    %139 = arith.addf %137, %138 : vector<8x32xf32>
    %140 = math.tanh %139 : vector<8x32xf32>
    %141 = arith.mulf %136, %140 : vector<8x32xf32>
    %142 = vector.extract_strided_slice %120 {offsets = [0, 128], sizes = [8, 128], strides = [1, 1]} : vector<8x256xf32> to vector<8x128xf32>
    %143 = arith.addf %142, %6 : vector<8x128xf32>
    %144 = arith.negf %143 : vector<8x128xf32>
    %145 = math.exp %144 : vector<8x128xf32>
    %cst_30 = arith.constant 1.000000e+00 : f32
    %146 = vector.broadcast %cst_30 : f32 to vector<8x128xf32>
    %147 = arith.addf %146, %145 : vector<8x128xf32>
    %148 = arith.divf %146, %147 : vector<8x128xf32>
    %149 = vector.extract_strided_slice %148 {offsets = [0, 0], sizes = [8, 32], strides = [1, 1]} : vector<8x128xf32> to vector<8x32xf32>
    %150 = vector.extract_strided_slice %148 {offsets = [0, 32], sizes = [8, 32], strides = [1, 1]} : vector<8x128xf32> to vector<8x32xf32>
    %151 = vector.extract_strided_slice %148 {offsets = [0, 64], sizes = [8, 32], strides = [1, 1]} : vector<8x128xf32> to vector<8x32xf32>
    %cst_31 = arith.constant 2.000000e+00 : f32
    %152 = vector.broadcast %cst_31 : f32 to vector<8x32xf32>
    %153 = arith.mulf %152, %151 : vector<8x32xf32>
    %cst_32 = arith.constant 1.000000e+00 : f32
    %154 = vector.broadcast %cst_32 : f32 to vector<8x32xf32>
    %155 = arith.subf %153, %154 : vector<8x32xf32>
    %156 = vector.extract_strided_slice %148 {offsets = [0, 96], sizes = [8, 32], strides = [1, 1]} : vector<8x128xf32> to vector<8x32xf32>
    %157 = arith.mulf %150, %116 : vector<8x32xf32>
    %158 = arith.mulf %149, %155 : vector<8x32xf32>
    %159 = arith.addf %157, %158 : vector<8x32xf32>
    %160 = math.tanh %159 : vector<8x32xf32>
    %161 = arith.mulf %156, %160 : vector<8x32xf32>
    %162 = tpu.concatenate %141, %161 in 1 : vector<8x32xf32>, vector<8x32xf32> -> vector<8x64xf32>
    %cst_33 = arith.constant dense<0.000000e+00> : vector<8x256xf32>
    %163 = tpu.matmul %162, %1, %cst_33 {dimension_numbers = #tpu.dot_dimension_numbers<[1], [0], [0], [1], [0, 0, 1, 1], [], []>} : vector<8x64xf32>, vector<64x256xf32>, vector<8x256xf32> -> vector<8x256xf32>
    %164 = vector.extract_strided_slice %163 {offsets = [0, 0], sizes = [8, 128], strides = [1, 1]} : vector<8x256xf32> to vector<8x128xf32>
    %165 = vector.extract_strided_slice %8 {offsets = [32, 0], sizes = [8, 128], strides = [1, 1]} : vector<64x128xf32> to vector<8x128xf32>
    %166 = arith.addf %164, %165 : vector<8x128xf32>
    %167 = arith.negf %166 : vector<8x128xf32>
    %168 = math.exp %167 : vector<8x128xf32>
    %cst_34 = arith.constant 1.000000e+00 : f32
    %169 = vector.broadcast %cst_34 : f32 to vector<8x128xf32>
    %170 = arith.addf %169, %168 : vector<8x128xf32>
    %171 = arith.divf %169, %170 : vector<8x128xf32>
    %172 = vector.extract_strided_slice %171 {offsets = [0, 0], sizes = [8, 32], strides = [1, 1]} : vector<8x128xf32> to vector<8x32xf32>
    %173 = vector.extract_strided_slice %171 {offsets = [0, 32], sizes = [8, 32], strides = [1, 1]} : vector<8x128xf32> to vector<8x32xf32>
    %174 = vector.extract_strided_slice %171 {offsets = [0, 64], sizes = [8, 32], strides = [1, 1]} : vector<8x128xf32> to vector<8x32xf32>
    %cst_35 = arith.constant 2.000000e+00 : f32
    %175 = vector.broadcast %cst_35 : f32 to vector<8x32xf32>
    %176 = arith.mulf %175, %174 : vector<8x32xf32>
    %cst_36 = arith.constant 1.000000e+00 : f32
    %177 = vector.broadcast %cst_36 : f32 to vector<8x32xf32>
    %178 = arith.subf %176, %177 : vector<8x32xf32>
    %179 = vector.extract_strided_slice %171 {offsets = [0, 96], sizes = [8, 32], strides = [1, 1]} : vector<8x128xf32> to vector<8x32xf32>
    %180 = arith.mulf %173, %139 : vector<8x32xf32>
    %181 = arith.mulf %172, %178 : vector<8x32xf32>
    %182 = arith.addf %180, %181 : vector<8x32xf32>
    %183 = math.tanh %182 : vector<8x32xf32>
    %184 = arith.mulf %179, %183 : vector<8x32xf32>
    %185 = vector.extract_strided_slice %163 {offsets = [0, 128], sizes = [8, 128], strides = [1, 1]} : vector<8x256xf32> to vector<8x128xf32>
    %186 = arith.addf %185, %6 : vector<8x128xf32>
    %187 = arith.negf %186 : vector<8x128xf32>
    %188 = math.exp %187 : vector<8x128xf32>
    %cst_37 = arith.constant 1.000000e+00 : f32
    %189 = vector.broadcast %cst_37 : f32 to vector<8x128xf32>
    %190 = arith.addf %189, %188 : vector<8x128xf32>
    %191 = arith.divf %189, %190 : vector<8x128xf32>
    %192 = vector.extract_strided_slice %191 {offsets = [0, 0], sizes = [8, 32], strides = [1, 1]} : vector<8x128xf32> to vector<8x32xf32>
    %193 = vector.extract_strided_slice %191 {offsets = [0, 32], sizes = [8, 32], strides = [1, 1]} : vector<8x128xf32> to vector<8x32xf32>
    %194 = vector.extract_strided_slice %191 {offsets = [0, 64], sizes = [8, 32], strides = [1, 1]} : vector<8x128xf32> to vector<8x32xf32>
    %cst_38 = arith.constant 2.000000e+00 : f32
    %195 = vector.broadcast %cst_38 : f32 to vector<8x32xf32>
    %196 = arith.mulf %195, %194 : vector<8x32xf32>
    %cst_39 = arith.constant 1.000000e+00 : f32
    %197 = vector.broadcast %cst_39 : f32 to vector<8x32xf32>
    %198 = arith.subf %196, %197 : vector<8x32xf32>
    %199 = vector.extract_strided_slice %191 {offsets = [0, 96], sizes = [8, 32], strides = [1, 1]} : vector<8x128xf32> to vector<8x32xf32>
    %200 = arith.mulf %193, %159 : vector<8x32xf32>
    %201 = arith.mulf %192, %198 : vector<8x32xf32>
    %202 = arith.addf %200, %201 : vector<8x32xf32>
    %203 = math.tanh %202 : vector<8x32xf32>
    %204 = arith.mulf %199, %203 : vector<8x32xf32>
    %205 = tpu.concatenate %184, %204 in 1 : vector<8x32xf32>, vector<8x32xf32> -> vector<8x64xf32>
    %cst_40 = arith.constant dense<0.000000e+00> : vector<8x256xf32>
    %206 = tpu.matmul %205, %1, %cst_40 {dimension_numbers = #tpu.dot_dimension_numbers<[1], [0], [0], [1], [0, 0, 1, 1], [], []>} : vector<8x64xf32>, vector<64x256xf32>, vector<8x256xf32> -> vector<8x256xf32>
    %207 = vector.extract_strided_slice %206 {offsets = [0, 0], sizes = [8, 128], strides = [1, 1]} : vector<8x256xf32> to vector<8x128xf32>
    %208 = vector.extract_strided_slice %8 {offsets = [40, 0], sizes = [8, 128], strides = [1, 1]} : vector<64x128xf32> to vector<8x128xf32>
    %209 = arith.addf %207, %208 : vector<8x128xf32>
    %210 = arith.negf %209 : vector<8x128xf32>
    %211 = math.exp %210 : vector<8x128xf32>
    %cst_41 = arith.constant 1.000000e+00 : f32
    %212 = vector.broadcast %cst_41 : f32 to vector<8x128xf32>
    %213 = arith.addf %212, %211 : vector<8x128xf32>
    %214 = arith.divf %212, %213 : vector<8x128xf32>
    %215 = vector.extract_strided_slice %214 {offsets = [0, 0], sizes = [8, 32], strides = [1, 1]} : vector<8x128xf32> to vector<8x32xf32>
    %216 = vector.extract_strided_slice %214 {offsets = [0, 32], sizes = [8, 32], strides = [1, 1]} : vector<8x128xf32> to vector<8x32xf32>
    %217 = vector.extract_strided_slice %214 {offsets = [0, 64], sizes = [8, 32], strides = [1, 1]} : vector<8x128xf32> to vector<8x32xf32>
    %cst_42 = arith.constant 2.000000e+00 : f32
    %218 = vector.broadcast %cst_42 : f32 to vector<8x32xf32>
    %219 = arith.mulf %218, %217 : vector<8x32xf32>
    %cst_43 = arith.constant 1.000000e+00 : f32
    %220 = vector.broadcast %cst_43 : f32 to vector<8x32xf32>
    %221 = arith.subf %219, %220 : vector<8x32xf32>
    %222 = vector.extract_strided_slice %214 {offsets = [0, 96], sizes = [8, 32], strides = [1, 1]} : vector<8x128xf32> to vector<8x32xf32>
    %223 = arith.mulf %216, %182 : vector<8x32xf32>
    %224 = arith.mulf %215, %221 : vector<8x32xf32>
    %225 = arith.addf %223, %224 : vector<8x32xf32>
    %226 = math.tanh %225 : vector<8x32xf32>
    %227 = arith.mulf %222, %226 : vector<8x32xf32>
    %228 = vector.extract_strided_slice %206 {offsets = [0, 128], sizes = [8, 128], strides = [1, 1]} : vector<8x256xf32> to vector<8x128xf32>
    %229 = arith.addf %228, %6 : vector<8x128xf32>
    %230 = arith.negf %229 : vector<8x128xf32>
    %231 = math.exp %230 : vector<8x128xf32>
    %cst_44 = arith.constant 1.000000e+00 : f32
    %232 = vector.broadcast %cst_44 : f32 to vector<8x128xf32>
    %233 = arith.addf %232, %231 : vector<8x128xf32>
    %234 = arith.divf %232, %233 : vector<8x128xf32>
    %235 = vector.extract_strided_slice %234 {offsets = [0, 0], sizes = [8, 32], strides = [1, 1]} : vector<8x128xf32> to vector<8x32xf32>
    %236 = vector.extract_strided_slice %234 {offsets = [0, 32], sizes = [8, 32], strides = [1, 1]} : vector<8x128xf32> to vector<8x32xf32>
    %237 = vector.extract_strided_slice %234 {offsets = [0, 64], sizes = [8, 32], strides = [1, 1]} : vector<8x128xf32> to vector<8x32xf32>
    %cst_45 = arith.constant 2.000000e+00 : f32
    %238 = vector.broadcast %cst_45 : f32 to vector<8x32xf32>
    %239 = arith.mulf %238, %237 : vector<8x32xf32>
    %cst_46 = arith.constant 1.000000e+00 : f32
    %240 = vector.broadcast %cst_46 : f32 to vector<8x32xf32>
    %241 = arith.subf %239, %240 : vector<8x32xf32>
    %242 = vector.extract_strided_slice %234 {offsets = [0, 96], sizes = [8, 32], strides = [1, 1]} : vector<8x128xf32> to vector<8x32xf32>
    %243 = arith.mulf %236, %202 : vector<8x32xf32>
    %244 = arith.mulf %235, %241 : vector<8x32xf32>
    %245 = arith.addf %243, %244 : vector<8x32xf32>
    %246 = math.tanh %245 : vector<8x32xf32>
    %247 = arith.mulf %242, %246 : vector<8x32xf32>
    %248 = tpu.concatenate %227, %247 in 1 : vector<8x32xf32>, vector<8x32xf32> -> vector<8x64xf32>
    %cst_47 = arith.constant dense<0.000000e+00> : vector<8x256xf32>
    %249 = tpu.matmul %248, %1, %cst_47 {dimension_numbers = #tpu.dot_dimension_numbers<[1], [0], [0], [1], [0, 0, 1, 1], [], []>} : vector<8x64xf32>, vector<64x256xf32>, vector<8x256xf32> -> vector<8x256xf32>
    %250 = vector.extract_strided_slice %249 {offsets = [0, 0], sizes = [8, 128], strides = [1, 1]} : vector<8x256xf32> to vector<8x128xf32>
    %251 = vector.extract_strided_slice %8 {offsets = [48, 0], sizes = [8, 128], strides = [1, 1]} : vector<64x128xf32> to vector<8x128xf32>
    %252 = arith.addf %250, %251 : vector<8x128xf32>
    %253 = arith.negf %252 : vector<8x128xf32>
    %254 = math.exp %253 : vector<8x128xf32>
    %cst_48 = arith.constant 1.000000e+00 : f32
    %255 = vector.broadcast %cst_48 : f32 to vector<8x128xf32>
    %256 = arith.addf %255, %254 : vector<8x128xf32>
    %257 = arith.divf %255, %256 : vector<8x128xf32>
    %258 = vector.extract_strided_slice %257 {offsets = [0, 0], sizes = [8, 32], strides = [1, 1]} : vector<8x128xf32> to vector<8x32xf32>
    %259 = vector.extract_strided_slice %257 {offsets = [0, 32], sizes = [8, 32], strides = [1, 1]} : vector<8x128xf32> to vector<8x32xf32>
    %260 = vector.extract_strided_slice %257 {offsets = [0, 64], sizes = [8, 32], strides = [1, 1]} : vector<8x128xf32> to vector<8x32xf32>
    %cst_49 = arith.constant 2.000000e+00 : f32
    %261 = vector.broadcast %cst_49 : f32 to vector<8x32xf32>
    %262 = arith.mulf %261, %260 : vector<8x32xf32>
    %cst_50 = arith.constant 1.000000e+00 : f32
    %263 = vector.broadcast %cst_50 : f32 to vector<8x32xf32>
    %264 = arith.subf %262, %263 : vector<8x32xf32>
    %265 = vector.extract_strided_slice %257 {offsets = [0, 96], sizes = [8, 32], strides = [1, 1]} : vector<8x128xf32> to vector<8x32xf32>
    %266 = arith.mulf %259, %225 : vector<8x32xf32>
    %267 = arith.mulf %258, %264 : vector<8x32xf32>
    %268 = arith.addf %266, %267 : vector<8x32xf32>
    %269 = math.tanh %268 : vector<8x32xf32>
    %270 = arith.mulf %265, %269 : vector<8x32xf32>
    %271 = vector.extract_strided_slice %249 {offsets = [0, 128], sizes = [8, 128], strides = [1, 1]} : vector<8x256xf32> to vector<8x128xf32>
    %272 = arith.addf %271, %6 : vector<8x128xf32>
    %273 = arith.negf %272 : vector<8x128xf32>
    %274 = math.exp %273 : vector<8x128xf32>
    %cst_51 = arith.constant 1.000000e+00 : f32
    %275 = vector.broadcast %cst_51 : f32 to vector<8x128xf32>
    %276 = arith.addf %275, %274 : vector<8x128xf32>
    %277 = arith.divf %275, %276 : vector<8x128xf32>
    %278 = vector.extract_strided_slice %277 {offsets = [0, 0], sizes = [8, 32], strides = [1, 1]} : vector<8x128xf32> to vector<8x32xf32>
    %279 = vector.extract_strided_slice %277 {offsets = [0, 32], sizes = [8, 32], strides = [1, 1]} : vector<8x128xf32> to vector<8x32xf32>
    %280 = vector.extract_strided_slice %277 {offsets = [0, 64], sizes = [8, 32], strides = [1, 1]} : vector<8x128xf32> to vector<8x32xf32>
    %cst_52 = arith.constant 2.000000e+00 : f32
    %281 = vector.broadcast %cst_52 : f32 to vector<8x32xf32>
    %282 = arith.mulf %281, %280 : vector<8x32xf32>
    %cst_53 = arith.constant 1.000000e+00 : f32
    %283 = vector.broadcast %cst_53 : f32 to vector<8x32xf32>
    %284 = arith.subf %282, %283 : vector<8x32xf32>
    %285 = vector.extract_strided_slice %277 {offsets = [0, 96], sizes = [8, 32], strides = [1, 1]} : vector<8x128xf32> to vector<8x32xf32>
    %286 = arith.mulf %279, %245 : vector<8x32xf32>
    %287 = arith.mulf %278, %284 : vector<8x32xf32>
    %288 = arith.addf %286, %287 : vector<8x32xf32>
    %289 = math.tanh %288 : vector<8x32xf32>
    %290 = arith.mulf %285, %289 : vector<8x32xf32>
    %291 = tpu.concatenate %270, %290 in 1 : vector<8x32xf32>, vector<8x32xf32> -> vector<8x64xf32>
    %cst_54 = arith.constant dense<0.000000e+00> : vector<8x256xf32>
    %292 = tpu.matmul %291, %1, %cst_54 {dimension_numbers = #tpu.dot_dimension_numbers<[1], [0], [0], [1], [0, 0, 1, 1], [], []>} : vector<8x64xf32>, vector<64x256xf32>, vector<8x256xf32> -> vector<8x256xf32>
    %293 = vector.extract_strided_slice %292 {offsets = [0, 0], sizes = [8, 128], strides = [1, 1]} : vector<8x256xf32> to vector<8x128xf32>
    %294 = vector.extract_strided_slice %8 {offsets = [56, 0], sizes = [8, 128], strides = [1, 1]} : vector<64x128xf32> to vector<8x128xf32>
    %295 = arith.addf %293, %294 : vector<8x128xf32>
    %296 = arith.negf %295 : vector<8x128xf32>
    %297 = math.exp %296 : vector<8x128xf32>
    %cst_55 = arith.constant 1.000000e+00 : f32
    %298 = vector.broadcast %cst_55 : f32 to vector<8x128xf32>
    %299 = arith.addf %298, %297 : vector<8x128xf32>
    %300 = arith.divf %298, %299 : vector<8x128xf32>
    %301 = vector.extract_strided_slice %300 {offsets = [0, 0], sizes = [8, 32], strides = [1, 1]} : vector<8x128xf32> to vector<8x32xf32>
    %302 = vector.extract_strided_slice %300 {offsets = [0, 32], sizes = [8, 32], strides = [1, 1]} : vector<8x128xf32> to vector<8x32xf32>
    %303 = vector.extract_strided_slice %300 {offsets = [0, 64], sizes = [8, 32], strides = [1, 1]} : vector<8x128xf32> to vector<8x32xf32>
    %cst_56 = arith.constant 2.000000e+00 : f32
    %304 = vector.broadcast %cst_56 : f32 to vector<8x32xf32>
    %305 = arith.mulf %304, %303 : vector<8x32xf32>
    %cst_57 = arith.constant 1.000000e+00 : f32
    %306 = vector.broadcast %cst_57 : f32 to vector<8x32xf32>
    %307 = arith.subf %305, %306 : vector<8x32xf32>
    %308 = vector.extract_strided_slice %300 {offsets = [0, 96], sizes = [8, 32], strides = [1, 1]} : vector<8x128xf32> to vector<8x32xf32>
    %309 = arith.mulf %302, %268 : vector<8x32xf32>
    %310 = arith.mulf %301, %307 : vector<8x32xf32>
    %311 = arith.addf %309, %310 : vector<8x32xf32>
    %312 = math.tanh %311 : vector<8x32xf32>
    %313 = arith.mulf %308, %312 : vector<8x32xf32>
    %314 = vector.extract_strided_slice %292 {offsets = [0, 128], sizes = [8, 128], strides = [1, 1]} : vector<8x256xf32> to vector<8x128xf32>
    %315 = arith.addf %314, %6 : vector<8x128xf32>
    %316 = arith.negf %315 : vector<8x128xf32>
    %317 = math.exp %316 : vector<8x128xf32>
    %cst_58 = arith.constant 1.000000e+00 : f32
    %318 = vector.broadcast %cst_58 : f32 to vector<8x128xf32>
    %319 = arith.addf %318, %317 : vector<8x128xf32>
    %320 = arith.divf %318, %319 : vector<8x128xf32>
    %321 = vector.extract_strided_slice %320 {offsets = [0, 0], sizes = [8, 32], strides = [1, 1]} : vector<8x128xf32> to vector<8x32xf32>
    %322 = vector.extract_strided_slice %320 {offsets = [0, 32], sizes = [8, 32], strides = [1, 1]} : vector<8x128xf32> to vector<8x32xf32>
    %323 = vector.extract_strided_slice %320 {offsets = [0, 64], sizes = [8, 32], strides = [1, 1]} : vector<8x128xf32> to vector<8x32xf32>
    %cst_59 = arith.constant 2.000000e+00 : f32
    %324 = vector.broadcast %cst_59 : f32 to vector<8x32xf32>
    %325 = arith.mulf %324, %323 : vector<8x32xf32>
    %cst_60 = arith.constant 1.000000e+00 : f32
    %326 = vector.broadcast %cst_60 : f32 to vector<8x32xf32>
    %327 = arith.subf %325, %326 : vector<8x32xf32>
    %328 = vector.extract_strided_slice %320 {offsets = [0, 96], sizes = [8, 32], strides = [1, 1]} : vector<8x128xf32> to vector<8x32xf32>
    %329 = arith.mulf %322, %288 : vector<8x32xf32>
    %330 = arith.mulf %321, %327 : vector<8x32xf32>
    %331 = arith.addf %329, %330 : vector<8x32xf32>
    %332 = math.tanh %331 : vector<8x32xf32>
    %333 = arith.mulf %328, %332 : vector<8x32xf32>
    %334 = tpu.concatenate %313, %333 in 1 : vector<8x32xf32>, vector<8x32xf32> -> vector<8x64xf32>
    %cst_61 = arith.constant dense<0.000000e+00> : vector<8x256xf32>
    %335 = tpu.matmul %334, %1, %cst_61 {dimension_numbers = #tpu.dot_dimension_numbers<[1], [0], [0], [1], [0, 0, 1, 1], [], []>} : vector<8x64xf32>, vector<64x256xf32>, vector<8x256xf32> -> vector<8x256xf32>
    %336 = vector.extract_strided_slice %335 {offsets = [0, 128], sizes = [8, 128], strides = [1, 1]} : vector<8x256xf32> to vector<8x128xf32>
    %337 = arith.addf %336, %6 : vector<8x128xf32>
    %338 = arith.negf %337 : vector<8x128xf32>
    %339 = math.exp %338 : vector<8x128xf32>
    %cst_62 = arith.constant 1.000000e+00 : f32
    %340 = vector.broadcast %cst_62 : f32 to vector<8x128xf32>
    %341 = arith.addf %340, %339 : vector<8x128xf32>
    %342 = arith.divf %340, %341 : vector<8x128xf32>
    %343 = vector.extract_strided_slice %342 {offsets = [0, 0], sizes = [8, 32], strides = [1, 1]} : vector<8x128xf32> to vector<8x32xf32>
    %344 = vector.extract_strided_slice %342 {offsets = [0, 32], sizes = [8, 32], strides = [1, 1]} : vector<8x128xf32> to vector<8x32xf32>
    %345 = vector.extract_strided_slice %342 {offsets = [0, 64], sizes = [8, 32], strides = [1, 1]} : vector<8x128xf32> to vector<8x32xf32>
    %cst_63 = arith.constant 2.000000e+00 : f32
    %346 = vector.broadcast %cst_63 : f32 to vector<8x32xf32>
    %347 = arith.mulf %346, %345 : vector<8x32xf32>
    %cst_64 = arith.constant 1.000000e+00 : f32
    %348 = vector.broadcast %cst_64 : f32 to vector<8x32xf32>
    %349 = arith.subf %347, %348 : vector<8x32xf32>
    %350 = vector.extract_strided_slice %342 {offsets = [0, 96], sizes = [8, 32], strides = [1, 1]} : vector<8x128xf32> to vector<8x32xf32>
    %351 = arith.mulf %344, %331 : vector<8x32xf32>
    %352 = arith.mulf %343, %349 : vector<8x32xf32>
    %353 = arith.addf %351, %352 : vector<8x32xf32>
    %354 = math.tanh %353 : vector<8x32xf32>
    %355 = arith.mulf %350, %354 : vector<8x32xf32>
    %cst_65 = arith.constant dense<0.000000e+00> : vector<8x128xf32>
    %356 = tpu.matmul %355, %4, %cst_65 {dimension_numbers = #tpu.dot_dimension_numbers<[1], [0], [0], [1], [0, 0, 1, 1], [], []>} : vector<8x32xf32>, vector<32x128xf32>, vector<8x128xf32> -> vector<8x128xf32>
    %357 = vector.broadcast %3 : vector<1x128xf32> to vector<8x128xf32>
    %358 = arith.addf %356, %357 : vector<8x128xf32>
    %c0_66 = arith.constant 0 : index
    %c0_67 = arith.constant 0 : index
    %359 = vector.load %arg2[%c0_66, %c0_67] : memref<8x128xf32, #tpu.memory_space<vmem>>, vector<8x128xf32>
    tpu.vector_store %arg2[%c0_66, %c0_67], %358 {strides = array<i32>} : memref<8x128xf32, #tpu.memory_space<vmem>>, vector<8x128xf32>,
    return
  }
}

</mosaic_0001>

<bundles_post_ra>
// kernel: tpu_custom_call.1
= control target key start
LH: loop header
LB: loop body
LE: loop exit
PB: predicated region body
PF: predicated region fallthrough
CT: control target
= control target key end

     0   :  { %7 = vsyncpa [#allocation3], 0  ;;  %s2119_s0 = inlined_call_operand.vmem [shape: f32[64,5], index: 0, kind: input, shape index: {}]   ;;  %s2120_s1 = inlined_call_operand.hbm [shape: f32[112,256], index: 1, kind: input, shape index: {}]   ;;  %s2121_s2 = inlined_call_operand.hbm [shape: f32[8,128], index: 2, kind: output, shape index: {}]  }
   0x1   :  { %8 = vsyncpa [#allocation4], 0  ;;  %s1824_s9 = smov [#allocation2]   ;;  %s1776_s13 = scalar_lea.hbm %s2120_s1, 3584 }
   0x2   :  { %s16_s10 = sshll.u32 %s1824_s9, 4  ;;  %p1777_p0 = scmp.ne.s32.totalorder %s2120_s1, %s1776_s13  ;;  %s17_s10 = int_to_ptr.vmem [resolvable:$true] %s16_s10 }
   0x3   :  { %p1780_p1 = scmp.lt.u32.totalorder %s1776_s13, %s2120_s1 }
   0x5   :  { %p1782_p2 = pnand %p1780_p1, %p1777_p0 }
   0x7   :  { %1785 = shalt.err (!%p1782_p2)
}
   0x8   :  { %s1786_s18 = scalar_lea.vmem %s17_s10, 3584  ;;  %p1791_p4 = scmp.lt.s32.totalorder %s17_s10, %s17_s10 }
   0x9   :  { %p1787_p3 = scmp.ne.s32.totalorder %s17_s10, %s1786_s18  ;;  %p1792_p5 = scmp.lt.s32.totalorder %s1786_s18, %s1786_s18 }
   0xb   :  { %p1793_p6 = por %p1792_p5, %p1791_p4 }
   0xd   :  { %p1794_p7 = pnand %p1793_p6, %p1787_p3 }
   0xf   :  { %1797 = shalt.err (!%p1794_p7)
}
  0x10   :  { %s1825_s19 = smov 256   ;;  %s1826_s20 = smov 16  }
  0x11   :  { %22 = dma.hbm_to_vmem [thread:$0]  %s2120_s1, 3584, %s17_s10, [#allocation3], %s1825_s19, %s1825_s19, %s1826_s20  }
  0x12   :  { %1820 = dma.done.wait [#allocation3], 3584  }
  0x13   :  { %1821 = vsyncadd [#allocation3], 4294963712  ;;  %v1827_v0 = vmov 0.0   ;;  %v28_v1 = vld [vmem:[#allocation2 + $0x18] sm:$0xff]  ;;  %v30_v2 = vld [vmem:[#allocation2 + $0x28] sm:$0xff]  ;;  %vm82_vm0 = vcmask 1044480  }
  0x14   :  { %259 = vmatprep.mubr.f32.mxu1 %v1827_v0  ;;  %v27_v3 = vld [vmem:[#allocation2 + $0x10] sm:$0xff]  ;;  %v1861_v4 = vpack.c.bf16 %v30_v2, %v28_v1  ;;  %v29_v5 = vld [vmem:[#allocation2 + $0x20] sm:$0xff]  ;;  %v32_v6 = vld [vmem:[#allocation2 + $0x38] sm:$0xff]  ;;  %vm57_vm1 = vcmask 39936   ;;  %s1828_s26 = smov 64   ;;  %s1829_s27 = smov 32  }
  0x15   :  { %v34_v7 = vld [vmem:[#allocation2 + $0x48] sm:$0xff]  ;;  %v1863_v8 = vpack.c.bf16 %v29_v5, %v27_v3  ;;  %v31_v10 = vld [vmem:[#allocation2 + $0x30] sm:$0xff]  ;;  %v33_v11 = vld [vmem:[#allocation2 + $0x40] sm:$0xff]  ;;  %vm295_vm2 = vcmask 261120   ;;  %vm191_vm3 = vcmask 523264   ;;  %vm1831_vm4 = vmmov 0  }
  0x16   :  { %v1865_v9 = vpack.c.bf16 %v34_v7, %v32_v6  ;;  %v36_v12 = vld [vmem:[#allocation2 + $0x58] sm:$0xff]  ;;  %1522 = vmatprep.subr.bf16.mxu1 %v1861_v4  ;;  %v38_v13 = vld [vmem:[#allocation2 + $0x68] sm:$0xff]  ;;  %v1869_v14 = vpack.c.bf16 %v33_v11, %v31_v10  ;;  %v26_v15 = vld [vmem:[#allocation2] sm:$0x1f] }
  0x17   :  { %1524 = vmatpush1.bf16.msra.mxu1 %v1863_v8  ;;  %v1872_v16 = vpack.c.bf16 %v38_v13, %v36_v12  ;;  %v35_v17 = vld [vmem:[#allocation2 + $0x50] sm:$0xff]  ;;  %v37_v18 = vld [vmem:[#allocation2 + $0x60] sm:$0xff]  ;;  %1496 = vmatprep.subr.msk.mxu0 %vm82_vm0, %v26_v15  ;;  %v40_v20 = vld [vmem:[#allocation2 + $0x78] sm:$0xff] }
  0x18   :  { %1526 = vmatprep.subr.bf16.mxu1 %v1865_v9  ;;  %v49_v19 = vld [vmem:[%s2119_s0] sm:$0xff]  ;;  %v42_v21 = vld [vmem:[#allocation2 + $0x88] sm:$0xff]  ;;  %1497 = vmatpush3.msk.msra.mxu0 %vm82_vm0, %v26_v15  ;;  %v1884_v23 = vpack.c.bf16 %v37_v18, %v35_v17  ;;  %v39_v25 = vld [vmem:[#allocation2 + $0x70] sm:$0xff] }
  0x19   :  { %1498 = vmatprep.mubr.msk.f32.mxu0 %vm57_vm1, %v49_v19  ;;  %v50_v22 = vld [vmem:[%s2119_s0 + $0x8] sm:$0xff]  ;;  %1538 = vmatprep.subr.bf16.mxu0 %v1861_v4  ;;  %v1888_v24 = vpack.c.bf16 %v42_v21, %v40_v20  ;;  %v41_v26 = vld [vmem:[#allocation2 + $0x80] sm:$0xff]  ;;  %v51_v44 = vld [vmem:[%s2119_s0 + $0x10] sm:$0xff] }
  0x1a   :  { %1499 = vmatmul.mubr.msk.f32.vlgmr.msra.gmra.mrb[0].mxu0 %vm57_vm1, %v50_v22  ;;  %v1892_v27 = vpack.c.bf16 %v41_v26, %v39_v25  ;;  %v52_v45 = vld [vmem:[%s2119_s0 + $0x18] sm:$0xff]  ;;  %v53_v46 = vld [vmem:[%s2119_s0 + $0x20] sm:$0xff]  ;;  %v54_v47 = vld [vmem:[%s2119_s0 + $0x28] sm:$0xff] }
  0x1b   :  { %1528 = vmatpush1.bf16.msra.mxu1 %v1869_v14  ;;  %1540 = vmatpush1.bf16.msra.mxu0 %v1863_v8  ;;  %v55_v48 = vld [vmem:[%s2119_s0 + $0x30] sm:$0xff]  ;;  %v56_v49 = vld [vmem:[%s2119_s0 + $0x38] sm:$0xff]  ;;  %s1832_s0 = smov [#allocation5]  }
  0x1c   :  { %1530 = vmatprep.subr.bf16.mxu1 %v1872_v16  ;;  %1542 = vmatprep.subr.bf16.mxu0 %v1865_v9  ;;  %v1970_v61 = vld [vmem:[#allocation2 + $0x90] ss:$0 sm:$0xff]  ;;  %s1423_s12 = sshll.u32 %s1832_s0, 4  ;;  %s1424_s12 = int_to_ptr.vmem [resolvable:$true] %s1423_s12 }
  0x1d   :  { %1501 = vmatprep.mubr.msk.f32.mxu0 %vm57_vm1, %v51_v44  ;;  %s1798_s13 = scalar_lea.vmem %s1424_s12, 128  ;;  %p1803_p9 = scmp.lt.s32.totalorder %s1424_s12, %s1424_s12 }
  0x1e   :  { %1502 = vmatmul.mubr.msk.f32.gmra.mrb[2].mxu0 %vm57_vm1, %v52_v45  ;;  %p1799_p8 = scmp.ne.s32.totalorder %s1424_s12, %s1798_s13  ;;  %p1804_p10 = scmp.lt.s32.totalorder %s1798_s13, %s1798_s13 }
  0x1f   :  { %1532 = vmatpush1.bf16.msra.mxu1 %v1884_v23  ;;  %1544 = vmatpush1.bf16.msra.mxu0 %v1869_v14 }
  0x20   :  { %1534 = vmatprep.subr.bf16.mxu1 %v1888_v24  ;;  %1546 = vmatprep.subr.bf16.mxu0 %v1872_v16  ;;  %p1805_p11 = por %p1804_p10, %p1803_p9 }
  0x21   :  { %1504 = vmatprep.mubr.msk.f32.mxu0 %vm57_vm1, %v53_v46 }
  0x22   :  { %1505 = vmatmul.mubr.msk.f32.gmra.mrb[4].mxu0 %vm57_vm1, %v54_v47  ;;  %p1806_p12 = pnand %p1805_p11, %p1799_p8 }
  0x23   :  { %1536 = vmatpush1.bf16.msra.mxu1 %v1892_v27  ;;  %1548 = vmatpush1.bf16.msra.mxu0 %v1884_v23 }
  0x24   :  { %1550 = vmatprep.subr.bf16.mxu0 %v1888_v24  ;;  %1554 = vmatprep.subr.bf16.mxu1 %v1861_v4 }
  0x25   :  { %1507 = vmatprep.mubr.msk.f32.mxu0 %vm57_vm1, %v55_v48 }
  0x26   :  { %260 = vmatmul.mubr.f32.vlgmr.msra.gmra.mrb[0].mxu1 %v1827_v0  ;;  %1508 = vmatmul.mubr.msk.f32.gmra.mrb[6].mxu0 %vm57_vm1, %v56_v49 }
  0x27   :  { %1552 = vmatpush1.bf16.msra.mxu0 %v1892_v27  ;;  %1556 = vmatpush1.bf16.msra.mxu1 %v1863_v8 }
  0x28   :  { %1558 = vmatprep.subr.bf16.mxu1 %v1865_v9  ;;  %499 = vmatprep.mubr.f32.mxu1 %v1827_v0 }
  0x29   :  { %1570 = vmatprep.subr.bf16.mxu0 %v1861_v4  ;;  %364 = vmatprep.mubr.f32.mxu0 %v1827_v0 }
  0x2b   :  { %1560 = vmatpush1.bf16.msra.mxu1 %v1869_v14 }
  0x2c   :  { %1562 = vmatprep.subr.bf16.mxu1 %v1872_v16 }
  0x2f   :  { %1564 = vmatpush1.bf16.msra.mxu1 %v1884_v23 }
  0x30   :  { %1566 = vmatprep.subr.bf16.mxu1 %v1888_v24 }
  0x33   :  { %1568 = vmatpush1.bf16.msra.mxu1 %v1892_v27 }
  0x34   :  { %1586 = vmatprep.subr.bf16.mxu1 %v1861_v4 }
  0xed   :  { %v1913_v28 = vpop.f32.mrb[0].mxu0 }
  0xee   :  { %v152_v29 = vpop.f32.mrb[1].mxu0 }
  0xf1   :  { %v1947_v53 = vpop.f32.mrb[2].mxu0 }
  0xf2   :  { %v1949_v54 = vpop.f32.mrb[3].mxu0 }
  0xf5   :  { %v1951_v55 = vpop.f32.mrb[4].mxu0 }
  0xf6   :  { %v1953_v56 = vpop.f32.mrb[5].mxu0 }
  0xf9   :  { %v261_v30 = vpop.f32.mrb[0].mxu1  ;;  %v1955_v57 = vpop.f32.mrb[6].mxu0 }
  0xfa   :  { %v265_v31 = vadd.f32 %v261_v30, %v152_v29  ;;  %v263_v32 = vpop.f32.mrb[1].mxu1  ;;  %v1957_v58 = vpop.f32.mrb[7].mxu0 }
  0xfc   :  { %v1441_v33 = vmul.f32 -1.442695, %v265_v31 }
  0xfe   :  { %1680 = vpow2.f32 %v1441_v33 }
 0x108   :  { %v1681_v34 = vpop.eup %1680 }
 0x109   :  { %v269_v35 = vadd.f32 1.0, %v1681_v34 }
 0x10b   :  { %1682 = vrcp.f32 %v269_v35 }
 0x115   :  { %v1683_v36 = vpop.eup %1682 }
 0x116   :  { %v272_v37 = vmul.f32 2.0, %v1683_v36  ;;  %v274_v41 = vmul.f32 0.0, %v1683_v36 }
 0x118   :  { %v1442_v38 = vadd.f32 -1.0, %v272_v37 }
 0x11a   :  { %276 = vrot.lane.b32.xlu0 %v1442_v38, %s1828_s26 }
 0x18c   :  { %v277_v39 = vpop.permute.xlu0 %276 }
 0x18d   :  { %v279_v40 = vmul.f32 %v1683_v36, %v277_v39 }
 0x18f   :  { %281 = vrot.lane.b32.xlu0 %v279_v40, %s1829_s27 }
 0x201   :  { %v282_v42 = vpop.permute.xlu0 %281 }
 0x202   :  { %v1917_v43 = vadd.f32 %v282_v42, %v274_v41 }
 0x204   :  { %1684 = vtanh.f32 %v1917_v43 }
 0x20e   :  { %v1685_v50 = vpop.eup %1684 }
 0x20f   :  { %287 = vrot.lane.b32.xlu1 %v1685_v50, %s1828_s26 }
 0x281   :  { %v288_v51 = vpop.permute.xlu1 %287 }
 0x282   :  { %v290_v52 = vmul.f32 %v1683_v36, %v288_v51 }
 0x284   :  { %292 = vrot.lane.b32.xlu1 %v290_v52, %s1829_s27 }
 0x2f6   :  { %v293_v59 = vpop.permute.xlu1 %292 }
 0x2f7   :  { %v296_v60 = vsel %vm295_vm2, %v293_v59, 0.0 }
 0x2f8   :  { %1443 = vmatmul.mubr.msk.f32.vlgmr.msra.gmra.mrb[8].mxu0 %vm191_vm3, %v296_v60 }
 0x2f9   :  { %1572 = vmatpush1.bf16.msra.mxu0 %v1863_v8  ;;  %634 = vmatprep.mubr.f32.mxu0 %v1827_v0 }
 0x2fa   :  { %1574 = vmatprep.subr.bf16.mxu0 %v1865_v9 }
 0x2fd   :  { %1576 = vmatpush1.bf16.msra.mxu0 %v1869_v14 }
 0x2fe   :  { %1578 = vmatprep.subr.bf16.mxu0 %v1872_v16 }
 0x301   :  { %1580 = vmatpush1.bf16.msra.mxu0 %v1884_v23 }
 0x302   :  { %1582 = vmatprep.subr.bf16.mxu0 %v1888_v24 }
 0x305   :  { %1584 = vmatpush1.bf16.msra.mxu0 %v1892_v27 }
 0x306   :  { %1602 = vmatprep.subr.bf16.mxu0 %v1861_v4 }
 0x3cb   :  { %v366_v62 = vpop.f32.mrb[8].mxu0 }
 0x3cc   :  { %v371_v63 = vadd.f32 %v1913_v28, %v366_v62  ;;  %v368_v1 = vpop.f32.mrb[9].mxu0 }
 0x3cd   :  { %v397_v2 = vadd.f32 %v368_v1, %v1970_v61 }
 0x3ce   :  { %v1444_v3 = vmul.f32 -1.442695, %v371_v63 }
 0x3cf   :  { %v1446_v5 = vmul.f32 -1.442695, %v397_v2 }
 0x3d0   :  { %1686 = vpow2.f32 %v1444_v3 }
 0x3d1   :  { %1688 = vpow2.f32 %v1446_v5 }
 0x3da   :  { %v1687_v6 = vpop.eup %1686 }
 0x3db   :  { %v1689_v7 = vpop.eup %1688  ;;  %v375_v10 = vadd.f32 1.0, %v1687_v6 }
 0x3dc   :  { %v401_v11 = vadd.f32 1.0, %v1689_v7 }
 0x3dd   :  { %1690 = vrcp.f32 %v375_v10 }
 0x3de   :  { %1692 = vrcp.f32 %v401_v11 }
 0x3e7   :  { %v1691_v12 = vpop.eup %1690 }
 0x3e8   :  { %v1693_v13 = vpop.eup %1692  ;;  %v378_v15 = vmul.f32 2.0, %v1691_v12  ;;  %v380_v26 = vmul.f32 %v1691_v12, %v1917_v43 }
 0x3e9   :  { %v404_v17 = vmul.f32 2.0, %v1693_v13  ;;  %v406_v29 = vmul.f32 0.0, %v1693_v13 }
 0x3ea   :  { %v1445_v18 = vadd.f32 -1.0, %v378_v15 }
 0x3eb   :  { %v1447_v19 = vadd.f32 -1.0, %v404_v17 }
 0x3ec   :  { %382 = vrot.lane.b32.xlu0 %v1445_v18, %s1828_s26 }
 0x3ed   :  { %408 = vrot.lane.b32.xlu1 %v1447_v19, %s1828_s26 }
 0x45e   :  { %v383_v20 = vpop.permute.xlu0 %382 }
 0x45f   :  { %v385_v21 = vmul.f32 %v1691_v12, %v383_v20  ;;  %v409_v22 = vpop.permute.xlu1 %408 }
 0x460   :  { %v411_v25 = vmul.f32 %v1693_v13, %v409_v22 }
 0x461   :  { %387 = vrot.lane.b32.xlu0 %v385_v21, %s1829_s27 }
 0x462   :  { %413 = vrot.lane.b32.xlu1 %v411_v25, %s1829_s27 }
 0x4d3   :  { %v388_v28 = vpop.permute.xlu0 %387 }
 0x4d4   :  { %v390_v30 = vadd.f32 %v388_v28, %v380_v26  ;;  %v414_v31 = vpop.permute.xlu1 %413 }
 0x4d5   :  { %v416_v32 = vadd.f32 %v414_v31, %v406_v29 }
 0x4d6   :  { %1694 = vtanh.f32 %v390_v30 }
 0x4d7   :  { %1696 = vtanh.f32 %v416_v32 }
 0x4e0   :  { %v1695_v33 = vpop.eup %1694 }
 0x4e1   :  { %v1697_v34 = vpop.eup %1696  ;;  %393 = vrot.lane.b32.xlu0 %v1695_v33, %s1828_s26 }
 0x4e2   :  { %419 = vrot.lane.b32.xlu1 %v1697_v34, %s1828_s26 }
 0x553   :  { %v394_v35 = vpop.permute.xlu0 %393 }
 0x554   :  { %v396_v36 = vmul.f32 %v1691_v12, %v394_v35  ;;  %v420_v37 = vpop.permute.xlu1 %419 }
 0x555   :  { %v422_v38 = vmul.f32 %v1693_v13, %v420_v37 }
 0x556   :  { %424 = vrot.lane.b32.xlu0 %v396_v36, %s1829_s27 }
 0x557   :  { %428 = vrot.lane.b32.xlu1 %v422_v38, %s1828_s26 }
 0x5c8   :  { %v425_v39 = vpop.permute.xlu0 %424 }
 0x5c9   :  { %v429_v40 = vpop.permute.xlu1 %428 }
 0x5ca   :  { %v431_v41 = vsel %vm295_vm2, %v425_v39, %v429_v40 }
 0x5cb   :  { %1448 = vmatmul.mubr.msk.f32.vlgmr.msra.gmra.mrb[2].mxu1 %vm191_vm3, %v431_v41 }
 0x5cc   :  { %1588 = vmatpush1.bf16.msra.mxu1 %v1863_v8  ;;  %769 = vmatprep.mubr.f32.mxu1 %v1827_v0 }
 0x5cd   :  { %1590 = vmatprep.subr.bf16.mxu1 %v1865_v9 }
 0x5d0   :  { %1592 = vmatpush1.bf16.msra.mxu1 %v1869_v14 }
 0x5d1   :  { %1594 = vmatprep.subr.bf16.mxu1 %v1872_v16 }
 0x5d4   :  { %1596 = vmatpush1.bf16.msra.mxu1 %v1884_v23 }
 0x5d5   :  { %1598 = vmatprep.subr.bf16.mxu1 %v1888_v24 }
 0x5d8   :  { %1600 = vmatpush1.bf16.msra.mxu1 %v1892_v27 }
 0x5d9   :  { %1618 = vmatprep.subr.bf16.mxu1 %v1861_v4 }
 0x69e   :  { %v501_v42 = vpop.f32.mrb[2].mxu1 }
 0x69f   :  { %v506_v43 = vadd.f32 %v501_v42, %v1949_v54  ;;  %v503_v44 = vpop.f32.mrb[3].mxu1 }
 0x6a0   :  { %v532_v45 = vadd.f32 %v503_v44, %v1970_v61 }
 0x6a1   :  { %v1449_v46 = vmul.f32 -1.442695, %v506_v43 }
 0x6a2   :  { %v1451_v47 = vmul.f32 -1.442695, %v532_v45 }
 0x6a3   :  { %1698 = vpow2.f32 %v1449_v46 }
 0x6a4   :  { %1700 = vpow2.f32 %v1451_v47 }
 0x6ad   :  { %v1699_v48 = vpop.eup %1698 }
 0x6ae   :  { %v1701_v49 = vpop.eup %1700  ;;  %v510_v50 = vadd.f32 1.0, %v1699_v48 }
 0x6af   :  { %v536_v51 = vadd.f32 1.0, %v1701_v49 }
 0x6b0   :  { %1702 = vrcp.f32 %v510_v50 }
 0x6b1   :  { %1704 = vrcp.f32 %v536_v51 }
 0x6ba   :  { %v1703_v52 = vpop.eup %1702 }
 0x6bb   :  { %v1705_v59 = vpop.eup %1704  ;;  %v513_v60 = vmul.f32 2.0, %v1703_v52  ;;  %v515_v6 = vmul.f32 %v1703_v52, %v390_v30 }
 0x6bc   :  { %v539_v62 = vmul.f32 2.0, %v1705_v59  ;;  %v541_v10 = vmul.f32 %v1705_v59, %v416_v32 }
 0x6bd   :  { %v1450_v63 = vadd.f32 -1.0, %v513_v60 }
 0x6be   :  { %v1452_v1 = vadd.f32 -1.0, %v539_v62 }
 0x6bf   :  { %517 = vrot.lane.b32.xlu0 %v1450_v63, %s1828_s26 }
 0x6c0   :  { %543 = vrot.lane.b32.xlu1 %v1452_v1, %s1828_s26 }
 0x731   :  { %v518_v54 = vpop.permute.xlu0 %517 }
 0x732   :  { %v520_v2 = vmul.f32 %v1703_v52, %v518_v54  ;;  %v544_v3 = vpop.permute.xlu1 %543 }
 0x733   :  { %v546_v5 = vmul.f32 %v1705_v59, %v544_v3 }
 0x734   :  { %522 = vrot.lane.b32.xlu0 %v520_v2, %s1829_s27 }
 0x735   :  { %548 = vrot.lane.b32.xlu1 %v546_v5, %s1829_s27 }
 0x7a6   :  { %v523_v7 = vpop.permute.xlu0 %522 }
 0x7a7   :  { %v525_v11 = vadd.f32 %v523_v7, %v515_v6  ;;  %v549_v12 = vpop.permute.xlu1 %548 }
 0x7a8   :  { %v551_v13 = vadd.f32 %v549_v12, %v541_v10 }
 0x7a9   :  { %1706 = vtanh.f32 %v525_v11 }
 0x7aa   :  { %1708 = vtanh.f32 %v551_v13 }
 0x7b3   :  { %v1707_v15 = vpop.eup %1706 }
 0x7b4   :  { %v1709_v17 = vpop.eup %1708  ;;  %528 = vrot.lane.b32.xlu0 %v1707_v15, %s1828_s26 }
 0x7b5   :  { %554 = vrot.lane.b32.xlu1 %v1709_v17, %s1828_s26 }
 0x826   :  { %v529_v18 = vpop.permute.xlu0 %528 }
 0x827   :  { %v531_v19 = vmul.f32 %v1703_v52, %v529_v18  ;;  %v555_v20 = vpop.permute.xlu1 %554 }
 0x828   :  { %v557_v21 = vmul.f32 %v1705_v59, %v555_v20 }
 0x829   :  { %559 = vrot.lane.b32.xlu0 %v531_v19, %s1829_s27 }
 0x82a   :  { %563 = vrot.lane.b32.xlu1 %v557_v21, %s1828_s26 }
 0x89b   :  { %v560_v22 = vpop.permute.xlu0 %559 }
 0x89c   :  { %v564_v25 = vpop.permute.xlu1 %563 }
 0x89d   :  { %v566_v26 = vsel %vm295_vm2, %v560_v22, %v564_v25 }
 0x89e   :  { %1453 = vmatmul.mubr.msk.f32.vlgmr.msra.gmra.mrb[10].mxu0 %vm191_vm3, %v566_v26 }
 0x89f   :  { %1604 = vmatpush1.bf16.msra.mxu0 %v1863_v8  ;;  %904 = vmatprep.mubr.f32.mxu0 %v1827_v0 }
 0x8a0   :  { %1606 = vmatprep.subr.bf16.mxu0 %v1865_v9 }
 0x8a3   :  { %1608 = vmatpush1.bf16.msra.mxu0 %v1869_v14 }
 0x8a4   :  { %1610 = vmatprep.subr.bf16.mxu0 %v1872_v16 }
 0x8a7   :  { %1612 = vmatpush1.bf16.msra.mxu0 %v1884_v23 }
 0x8a8   :  { %1614 = vmatprep.subr.bf16.mxu0 %v1888_v24 }
 0x8ab   :  { %1616 = vmatpush1.bf16.msra.mxu0 %v1892_v27 }
 0x8ac   :  { %1634 = vmatprep.subr.bf16.mxu0 %v1861_v4 }
 0x971   :  { %v636_v28 = vpop.f32.mrb[10].mxu0 }
 0x972   :  { %v641_v29 = vadd.f32 %v1947_v53, %v636_v28  ;;  %v638_v30 = vpop.f32.mrb[11].mxu0 }
 0x973   :  { %v667_v31 = vadd.f32 %v638_v30, %v1970_v61 }
 0x974   :  { %v1454_v32 = vmul.f32 -1.442695, %v641_v29 }
 0x975   :  { %v1456_v33 = vmul.f32 -1.442695, %v667_v31 }
 0x976   :  { %1710 = vpow2.f32 %v1454_v32 }
 0x977   :  { %1712 = vpow2.f32 %v1456_v33 }
 0x980   :  { %v1711_v34 = vpop.eup %1710 }
 0x981   :  { %v1713_v35 = vpop.eup %1712  ;;  %v645_v36 = vadd.f32 1.0, %v1711_v34 }
 0x982   :  { %v671_v37 = vadd.f32 1.0, %v1713_v35 }
 0x983   :  { %1714 = vrcp.f32 %v645_v36 }
 0x984   :  { %1716 = vrcp.f32 %v671_v37 }
 0x98d   :  { %v1715_v38 = vpop.eup %1714 }
 0x98e   :  { %v1717_v39 = vpop.eup %1716  ;;  %v648_v40 = vmul.f32 2.0, %v1715_v38  ;;  %v650_v47 = vmul.f32 %v1715_v38, %v525_v11 }
 0x98f   :  { %v674_v41 = vmul.f32 2.0, %v1717_v39  ;;  %v676_v49 = vmul.f32 %v1717_v39, %v551_v13 }
 0x990   :  { %v1455_v42 = vadd.f32 -1.0, %v648_v40 }
 0x991   :  { %v1457_v43 = vadd.f32 -1.0, %v674_v41 }
 0x992   :  { %652 = vrot.lane.b32.xlu0 %v1455_v42, %s1828_s26 }
 0x993   :  { %678 = vrot.lane.b32.xlu1 %v1457_v43, %s1828_s26 }
 0xa04   :  { %v653_v53 = vpop.permute.xlu0 %652 }
 0xa05   :  { %v655_v44 = vmul.f32 %v1715_v38, %v653_v53  ;;  %v679_v45 = vpop.permute.xlu1 %678 }
 0xa06   :  { %v681_v46 = vmul.f32 %v1717_v39, %v679_v45 }
 0xa07   :  { %657 = vrot.lane.b32.xlu0 %v655_v44, %s1829_s27 }
 0xa08   :  { %683 = vrot.lane.b32.xlu1 %v681_v46, %s1829_s27 }
 0xa79   :  { %v658_v48 = vpop.permute.xlu0 %657 }
 0xa7a   :  { %v660_v50 = vadd.f32 %v658_v48, %v650_v47  ;;  %v684_v51 = vpop.permute.xlu1 %683 }
 0xa7b   :  { %v686_v52 = vadd.f32 %v684_v51, %v676_v49 }
 0xa7c   :  { %1718 = vtanh.f32 %v660_v50 }
 0xa7d   :  { %1720 = vtanh.f32 %v686_v52 }
 0xa86   :  { %v1719_v59 = vpop.eup %1718 }
 0xa87   :  { %v1721_v60 = vpop.eup %1720  ;;  %663 = vrot.lane.b32.xlu0 %v1719_v59, %s1828_s26 }
 0xa88   :  { %689 = vrot.lane.b32.xlu1 %v1721_v60, %s1828_s26 }
 0xaf9   :  { %v664_v62 = vpop.permute.xlu0 %663 }
 0xafa   :  { %v666_v63 = vmul.f32 %v1715_v38, %v664_v62  ;;  %v690_v1 = vpop.permute.xlu1 %689 }
 0xafb   :  { %v692_v54 = vmul.f32 %v1717_v39, %v690_v1 }
 0xafc   :  { %694 = vrot.lane.b32.xlu0 %v666_v63, %s1829_s27 }
 0xafd   :  { %698 = vrot.lane.b32.xlu1 %v692_v54, %s1828_s26 }
 0xb6e   :  { %v695_v2 = vpop.permute.xlu0 %694 }
 0xb6f   :  { %v699_v3 = vpop.permute.xlu1 %698 }
 0xb70   :  { %v701_v5 = vsel %vm295_vm2, %v695_v2, %v699_v3 }
 0xb71   :  { %1458 = vmatmul.mubr.msk.f32.vlgmr.msra.gmra.mrb[4].mxu1 %vm191_vm3, %v701_v5 }
 0xb72   :  { %1620 = vmatpush1.bf16.msra.mxu1 %v1863_v8  ;;  %1039 = vmatprep.mubr.f32.mxu1 %v1827_v0 }
 0xb73   :  { %1622 = vmatprep.subr.bf16.mxu1 %v1865_v9 }
 0xb76   :  { %1624 = vmatpush1.bf16.msra.mxu1 %v1869_v14 }
 0xb77   :  { %1626 = vmatprep.subr.bf16.mxu1 %v1872_v16 }
 0xb7a   :  { %1628 = vmatpush1.bf16.msra.mxu1 %v1884_v23 }
 0xb7b   :  { %1630 = vmatprep.subr.bf16.mxu1 %v1888_v24 }
 0xb7e   :  { %1632 = vmatpush1.bf16.msra.mxu1 %v1892_v27 }
 0xb7f   :  { %1650 = vmatprep.subr.bf16.mxu1 %v1861_v4 }
 0xc44   :  { %v771_v6 = vpop.f32.mrb[4].mxu1 }
 0xc45   :  { %v776_v7 = vadd.f32 %v771_v6, %v1953_v56  ;;  %v773_v10 = vpop.f32.mrb[5].mxu1 }
 0xc46   :  { %v802_v11 = vadd.f32 %v773_v10, %v1970_v61 }
 0xc47   :  { %v1459_v12 = vmul.f32 -1.442695, %v776_v7 }
 0xc48   :  { %v1461_v13 = vmul.f32 -1.442695, %v802_v11 }
 0xc49   :  { %1722 = vpow2.f32 %v1459_v12 }
 0xc4a   :  { %1724 = vpow2.f32 %v1461_v13 }
 0xc53   :  { %v1723_v15 = vpop.eup %1722 }
 0xc54   :  { %v1725_v17 = vpop.eup %1724  ;;  %v780_v18 = vadd.f32 1.0, %v1723_v15 }
 0xc55   :  { %v806_v19 = vadd.f32 1.0, %v1725_v17 }
 0xc56   :  { %1726 = vrcp.f32 %v780_v18 }
 0xc57   :  { %1728 = vrcp.f32 %v806_v19 }
 0xc60   :  { %v1727_v20 = vpop.eup %1726 }
 0xc61   :  { %v1729_v21 = vpop.eup %1728  ;;  %v783_v22 = vmul.f32 2.0, %v1727_v20  ;;  %v785_v31 = vmul.f32 %v1727_v20, %v660_v50 }
 0xc62   :  { %v809_v4 = vmul.f32 2.0, %v1729_v21  ;;  %v811_v33 = vmul.f32 %v1729_v21, %v686_v52 }
 0xc63   :  { %v1460_v25 = vadd.f32 -1.0, %v783_v22 }
 0xc64   :  { %v1462_v26 = vadd.f32 -1.0, %v809_v4 }
 0xc65   :  { %787 = vrot.lane.b32.xlu0 %v1460_v25, %s1828_s26 }
 0xc66   :  { %813 = vrot.lane.b32.xlu1 %v1462_v26, %s1828_s26 }
 0xcd7   :  { %v788_v56 = vpop.permute.xlu0 %787 }
 0xcd8   :  { %v790_v28 = vmul.f32 %v1727_v20, %v788_v56  ;;  %v814_v29 = vpop.permute.xlu1 %813 }
 0xcd9   :  { %v816_v30 = vmul.f32 %v1729_v21, %v814_v29 }
 0xcda   :  { %792 = vrot.lane.b32.xlu0 %v790_v28, %s1829_s27 }
 0xcdb   :  { %818 = vrot.lane.b32.xlu1 %v816_v30, %s1829_s27 }
 0xd4c   :  { %v793_v32 = vpop.permute.xlu0 %792 }
 0xd4d   :  { %v795_v34 = vadd.f32 %v793_v32, %v785_v31  ;;  %v819_v35 = vpop.permute.xlu1 %818 }
 0xd4e   :  { %v821_v36 = vadd.f32 %v819_v35, %v811_v33 }
 0xd4f   :  { %1730 = vtanh.f32 %v795_v34 }
 0xd50   :  { %1732 = vtanh.f32 %v821_v36 }
 0xd59   :  { %v1731_v37 = vpop.eup %1730 }
 0xd5a   :  { %v1733_v38 = vpop.eup %1732  ;;  %798 = vrot.lane.b32.xlu0 %v1731_v37, %s1828_s26 }
 0xd5b   :  { %824 = vrot.lane.b32.xlu1 %v1733_v38, %s1828_s26 }
 0xdcc   :  { %v799_v39 = vpop.permute.xlu0 %798 }
 0xdcd   :  { %v801_v40 = vmul.f32 %v1727_v20, %v799_v39  ;;  %v825_v41 = vpop.permute.xlu1 %824 }
 0xdce   :  { %v827_v42 = vmul.f32 %v1729_v21, %v825_v41 }
 0xdcf   :  { %829 = vrot.lane.b32.xlu0 %v801_v40, %s1829_s27 }
 0xdd0   :  { %833 = vrot.lane.b32.xlu1 %v827_v42, %s1828_s26 }
 0xe41   :  { %v830_v43 = vpop.permute.xlu0 %829 }
 0xe42   :  { %v834_v53 = vpop.permute.xlu1 %833 }
 0xe43   :  { %v836_v44 = vsel %vm295_vm2, %v830_v43, %v834_v53 }
 0xe44   :  { %1463 = vmatmul.mubr.msk.f32.vlgmr.msra.gmra.mrb[12].mxu0 %vm191_vm3, %v836_v44 }
 0xe45   :  { %1636 = vmatpush1.bf16.msra.mxu0 %v1863_v8  ;;  %1174 = vmatprep.mubr.f32.mxu0 %v1827_v0 }
 0xe46   :  { %1638 = vmatprep.subr.bf16.mxu0 %v1865_v9 }
 0xe49   :  { %1640 = vmatpush1.bf16.msra.mxu0 %v1869_v14 }
 0xe4a   :  { %1642 = vmatprep.subr.bf16.mxu0 %v1872_v16 }
 0xe4d   :  { %1644 = vmatpush1.bf16.msra.mxu0 %v1884_v23 }
 0xe4e   :  { %1646 = vmatprep.subr.bf16.mxu0 %v1888_v24 }
 0xe51   :  { %1648 = vmatpush1.bf16.msra.mxu0 %v1892_v27 }
 0xf17   :  { %v906_v45 = vpop.f32.mrb[12].mxu0 }
 0xf18   :  { %v911_v46 = vadd.f32 %v1951_v55, %v906_v45  ;;  %v908_v47 = vpop.f32.mrb[13].mxu0 }
 0xf19   :  { %v937_v48 = vadd.f32 %v908_v47, %v1970_v61 }
 0xf1a   :  { %v1464_v49 = vmul.f32 -1.442695, %v911_v46 }
 0xf1b   :  { %v1466_v50 = vmul.f32 -1.442695, %v937_v48 }
 0xf1c   :  { %1734 = vpow2.f32 %v1464_v49 }
 0xf1d   :  { %1736 = vpow2.f32 %v1466_v50 }
 0xf26   :  { %v1735_v51 = vpop.eup %1734 }
 0xf27   :  { %v1737_v52 = vpop.eup %1736  ;;  %v915_v59 = vadd.f32 1.0, %v1735_v51 }
 0xf28   :  { %v941_v60 = vadd.f32 1.0, %v1737_v52 }
 0xf29   :  { %1738 = vrcp.f32 %v915_v59 }
 0xf2a   :  { %1740 = vrcp.f32 %v941_v60 }
 0xf33   :  { %v1739_v62 = vpop.eup %1738 }
 0xf34   :  { %v1741_v63 = vpop.eup %1740  ;;  %v918_v1 = vmul.f32 2.0, %v1739_v62  ;;  %v920_v10 = vmul.f32 %v1739_v62, %v795_v34 }
 0xf35   :  { %v944_v54 = vmul.f32 2.0, %v1741_v63  ;;  %v946_v12 = vmul.f32 %v1741_v63, %v821_v36 }
 0xf36   :  { %v1465_v2 = vadd.f32 -1.0, %v918_v1 }
 0xf37   :  { %v1467_v3 = vadd.f32 -1.0, %v944_v54 }
 0xf38   :  { %922 = vrot.lane.b32.xlu0 %v1465_v2, %s1828_s26 }
 0xf39   :  { %948 = vrot.lane.b32.xlu1 %v1467_v3, %s1828_s26 }
 0xfaa   :  { %v923_v55 = vpop.permute.xlu0 %922 }
 0xfab   :  { %v925_v5 = vmul.f32 %v1739_v62, %v923_v55  ;;  %v949_v6 = vpop.permute.xlu1 %948 }
 0xfac   :  { %v951_v7 = vmul.f32 %v1741_v63, %v949_v6 }
 0xfad   :  { %927 = vrot.lane.b32.xlu0 %v925_v5, %s1829_s27 }
 0xfae   :  { %953 = vrot.lane.b32.xlu1 %v951_v7, %s1829_s27 }
0x101f   :  { %v928_v11 = vpop.permute.xlu0 %927 }
0x1020   :  { %v930_v13 = vadd.f32 %v928_v11, %v920_v10  ;;  %v954_v15 = vpop.permute.xlu1 %953 }
0x1021   :  { %v956_v17 = vadd.f32 %v954_v15, %v946_v12 }
0x1022   :  { %1742 = vtanh.f32 %v930_v13 }
0x1023   :  { %1744 = vtanh.f32 %v956_v17 }
0x102c   :  { %v1743_v18 = vpop.eup %1742 }
0x102d   :  { %v1745_v19 = vpop.eup %1744  ;;  %933 = vrot.lane.b32.xlu0 %v1743_v18, %s1828_s26 }
0x102e   :  { %959 = vrot.lane.b32.xlu1 %v1745_v19, %s1828_s26 }
0x109f   :  { %v934_v20 = vpop.permute.xlu0 %933 }
0x10a0   :  { %v936_v21 = vmul.f32 %v1739_v62, %v934_v20  ;;  %v960_v22 = vpop.permute.xlu1 %959 }
0x10a1   :  { %v962_v4 = vmul.f32 %v1741_v63, %v960_v22 }
0x10a2   :  { %964 = vrot.lane.b32.xlu0 %v936_v21, %s1829_s27 }
0x10a3   :  { %968 = vrot.lane.b32.xlu1 %v962_v4, %s1828_s26 }
0x1114   :  { %v965_v25 = vpop.permute.xlu0 %964 }
0x1115   :  { %v969_v26 = vpop.permute.xlu1 %968 }
0x1116   :  { %v971_v56 = vsel %vm295_vm2, %v965_v25, %v969_v26 }
0x1117   :  { %1468 = vmatmul.mubr.msk.f32.vlgmr.msra.gmra.mrb[6].mxu1 %vm191_vm3, %v971_v56 }
0x1118   :  { %1652 = vmatpush1.bf16.msra.mxu1 %v1863_v8  ;;  %1309 = vmatprep.mubr.f32.mxu1 %v1827_v0 }
0x1119   :  { %1654 = vmatprep.subr.bf16.mxu1 %v1865_v9 }
0x111c   :  { %1656 = vmatpush1.bf16.msra.mxu1 %v1869_v14 }
0x111d   :  { %1658 = vmatprep.subr.bf16.mxu1 %v1872_v16 }
0x1120   :  { %1660 = vmatpush1.bf16.msra.mxu1 %v1884_v23 }
0x1121   :  { %1662 = vmatprep.subr.bf16.mxu1 %v1888_v24 }
0x1124   :  { %1664 = vmatpush1.bf16.msra.mxu1 %v1892_v27 }
0x11ea   :  { %v1041_v28 = vpop.f32.mrb[6].mxu1 }
0x11eb   :  { %v1046_v29 = vadd.f32 %v1041_v28, %v1957_v58  ;;  %v1043_v30 = vpop.f32.mrb[7].mxu1 }
0x11ec   :  { %v1072_v8 = vadd.f32 %v1043_v30, %v1970_v61 }
0x11ed   :  { %v1469_v31 = vmul.f32 -1.442695, %v1046_v29 }
0x11ee   :  { %v1471_v32 = vmul.f32 -1.442695, %v1072_v8 }
0x11ef   :  { %1746 = vpow2.f32 %v1469_v31 }
0x11f0   :  { %1748 = vpow2.f32 %v1471_v32 }
0x11f9   :  { %v1747_v9 = vpop.eup %1746 }
0x11fa   :  { %v1749_v14 = vpop.eup %1748  ;;  %v1050_v33 = vadd.f32 1.0, %v1747_v9 }
0x11fb   :  { %v1076_v16 = vadd.f32 1.0, %v1749_v14 }
0x11fc   :  { %1750 = vrcp.f32 %v1050_v33 }
0x11fd   :  { %1752 = vrcp.f32 %v1076_v16 }
0x1206   :  { %v1751_v23 = vpop.eup %1750 }
0x1207   :  { %v1753_v24 = vpop.eup %1752  ;;  %v1053_v34 = vmul.f32 2.0, %v1751_v23  ;;  %v1055_v40 = vmul.f32 %v1751_v23, %v930_v13 }
0x1208   :  { %v1079_v27 = vmul.f32 2.0, %v1753_v24  ;;  %v1081_v42 = vmul.f32 %v1753_v24, %v956_v17 }
0x1209   :  { %v1470_v35 = vadd.f32 -1.0, %v1053_v34 }
0x120a   :  { %v1472_v36 = vadd.f32 -1.0, %v1079_v27 }
0x120b   :  { %1057 = vrot.lane.b32.xlu0 %v1470_v35, %s1828_s26 }
0x120c   :  { %1083 = vrot.lane.b32.xlu1 %v1472_v36, %s1828_s26 }
0x127d   :  { %v1058_v58 = vpop.permute.xlu0 %1057 }
0x127e   :  { %v1060_v37 = vmul.f32 %v1751_v23, %v1058_v58  ;;  %v1084_v38 = vpop.permute.xlu1 %1083 }
0x127f   :  { %v1086_v39 = vmul.f32 %v1753_v24, %v1084_v38 }
0x1280   :  { %1062 = vrot.lane.b32.xlu0 %v1060_v37, %s1829_s27 }
0x1281   :  { %1088 = vrot.lane.b32.xlu1 %v1086_v39, %s1829_s27 }
0x12f2   :  { %v1063_v41 = vpop.permute.xlu0 %1062 }
0x12f3   :  { %v1065_v43 = vadd.f32 %v1063_v41, %v1055_v40  ;;  %v1089_v53 = vpop.permute.xlu1 %1088 }
0x12f4   :  { %v1091_v44 = vadd.f32 %v1089_v53, %v1081_v42  ;;  %v45_v42 = vld [vmem:[#allocation2 + $0xa0] sm:$0xff]  ;;  %v1830_v53 = vmov 0.0|0.0  }
0x12f5   :  { %1754 = vtanh.f32 %v1065_v43  ;;  %1665 = vmatprep.subr.bf16.mxu0 %v1830_v53 }
0x12f6   :  { %1756 = vtanh.f32 %v1091_v44 }
0x12ff   :  { %v1755_v45 = vpop.eup %1754 }
0x1300   :  { %v1757_v46 = vpop.eup %1756  ;;  %1068 = vrot.lane.b32.xlu0 %v1755_v45, %s1828_s26  ;;  %v48_v45 = vld [vmem:[#allocation2 + $0xd0] sm:$0xff] }
0x1301   :  { %1094 = vrot.lane.b32.xlu1 %v1757_v46, %s1828_s26 }
0x1372   :  { %v1069_v47 = vpop.permute.xlu0 %1068 }
0x1373   :  { %v1071_v48 = vmul.f32 %v1751_v23, %v1069_v47  ;;  %v1095_v49 = vpop.permute.xlu1 %1094 }
0x1374   :  { %v1097_v50 = vmul.f32 %v1753_v24, %v1095_v49 }
0x1375   :  { %1099 = vrot.lane.b32.xlu0 %v1071_v48, %s1829_s27 }
0x1376   :  { %1103 = vrot.lane.b32.xlu1 %v1097_v50, %s1828_s26 }
0x13e7   :  { %v1100_v51 = vpop.permute.xlu0 %1099 }
0x13e8   :  { %v1104_v52 = vpop.permute.xlu1 %1103 }
0x13e9   :  { %v1106_v59 = vsel %vm295_vm2, %v1100_v51, %v1104_v52  ;;  %v44_v51 = vld [vmem:[#allocation2 + $0x98] ss:$0 sm:$0xff] }
0x13ea   :  { %1473 = vmatmul.mubr.msk.f32.vlgmr.msra.gmra.mrb[14].mxu0 %vm191_vm3, %v1106_v59 }
0x13eb   :  { %1518 = vmatprep.mubr.msk.f32.mxu0 %vm1831_vm4, %v1827_v0 }
0x14bd   :  { %v1176_v60 = vpop.f32.mrb[14].mxu0 }
0x14be   :  { %v1181_v62 = vadd.f32 %v1955_v57, %v1176_v60  ;;  %v1178_v63 = vpop.f32.mrb[15].mxu0 }
0x14bf   :  { %v1207_v1 = vadd.f32 %v1178_v63, %v1970_v61 }
0x14c0   :  { %v1474_v54 = vmul.f32 -1.442695, %v1181_v62 }
0x14c1   :  { %v1476_v2 = vmul.f32 -1.442695, %v1207_v1 }
0x14c2   :  { %1758 = vpow2.f32 %v1474_v54 }
0x14c3   :  { %1760 = vpow2.f32 %v1476_v2 }
0x14cc   :  { %v1759_v3 = vpop.eup %1758 }
0x14cd   :  { %v1761_v55 = vpop.eup %1760  ;;  %v1185_v5 = vadd.f32 1.0, %v1759_v3 }
0x14ce   :  { %v1211_v6 = vadd.f32 1.0, %v1761_v55 }
0x14cf   :  { %1762 = vrcp.f32 %v1185_v5 }
0x14d0   :  { %1764 = vrcp.f32 %v1211_v6 }
0x14d9   :  { %v1763_v7 = vpop.eup %1762 }
0x14da   :  { %v1765_v10 = vpop.eup %1764  ;;  %v1188_v11 = vmul.f32 2.0, %v1763_v7  ;;  %v1190_v20 = vmul.f32 %v1763_v7, %v1065_v43  ;;  %v47_v43 = vld [vmem:[#allocation2 + $0xc0] sm:$0xff] }
0x14db   :  { %v1214_v12 = vmul.f32 2.0, %v1765_v10  ;;  %v1216_v22 = vmul.f32 %v1765_v10, %v1091_v44  ;;  %v1669_v46 = vpack.c.bf16 %v48_v45, %v47_v43 }
0x14dc   :  { %v1475_v13 = vadd.f32 -1.0, %v1188_v11 }
0x14dd   :  { %v1477_v15 = vadd.f32 -1.0, %v1214_v12 }
0x14de   :  { %1192 = vrot.lane.b32.xlu0 %v1475_v13, %s1828_s26 }
0x14df   :  { %1218 = vrot.lane.b32.xlu1 %v1477_v15, %s1828_s26 }
0x1550   :  { %v1193_v57 = vpop.permute.xlu0 %1192 }
0x1551   :  { %v1195_v17 = vmul.f32 %v1763_v7, %v1193_v57  ;;  %v1219_v18 = vpop.permute.xlu1 %1218 }
0x1552   :  { %v1221_v19 = vmul.f32 %v1765_v10, %v1219_v18 }
0x1553   :  { %1197 = vrot.lane.b32.xlu0 %v1195_v17, %s1829_s27 }
0x1554   :  { %1223 = vrot.lane.b32.xlu1 %v1221_v19, %s1829_s27 }
0x15c5   :  { %v1198_v21 = vpop.permute.xlu0 %1197 }
0x15c6   :  { %v1200_v4 = vadd.f32 %v1198_v21, %v1190_v20  ;;  %v1224_v25 = vpop.permute.xlu1 %1223 }
0x15c7   :  { %v1226_v26 = vadd.f32 %v1224_v25, %v1216_v22 }
0x15c8   :  { %1766 = vtanh.f32 %v1200_v4 }
0x15c9   :  { %1768 = vtanh.f32 %v1226_v26 }
0x15d2   :  { %v1767_v56 = vpop.eup %1766 }
0x15d3   :  { %v1769_v28 = vpop.eup %1768  ;;  %1203 = vrot.lane.b32.xlu0 %v1767_v56, %s1828_s26 }
0x15d4   :  { %1229 = vrot.lane.b32.xlu1 %v1769_v28, %s1828_s26 }
0x1645   :  { %v1204_v29 = vpop.permute.xlu0 %1203 }
0x1646   :  { %v1206_v30 = vmul.f32 %v1763_v7, %v1204_v29  ;;  %v1230_v8 = vpop.permute.xlu1 %1229 }
0x1647   :  { %v1232_v31 = vmul.f32 %v1765_v10, %v1230_v8 }
0x1648   :  { %1234 = vrot.lane.b32.xlu0 %v1206_v30, %s1829_s27 }
0x1649   :  { %1238 = vrot.lane.b32.xlu1 %v1232_v31, %s1828_s26 }
0x16ba   :  { %v1235_v32 = vpop.permute.xlu0 %1234 }
0x16bb   :  { %v1239_v9 = vpop.permute.xlu1 %1238 }
0x16bc   :  { %v1241_v14 = vsel %vm295_vm2, %v1235_v32, %v1239_v9 }
0x16bd   :  { %1478 = vmatmul.mubr.msk.f32.vlgmr.msra.gmra.mrb[8].mxu1 %vm191_vm3, %v1241_v14 }
0x1790   :  { %v1311_v33 = vpop.f32.mrb[8].mxu1 }
0x1791   :  { %v1312_v16 = vpop.f32.mrb[9].mxu1 }
0x1792   :  { %v1315_v23 = vadd.f32 %v1312_v16, %v1970_v61  ;;  %v46_v61 = vld [vmem:[#allocation2 + $0xb0] sm:$0xff] }
0x1793   :  { %v1666_v44 = vpack.c.bf16 %v46_v61, %v45_v42 }
0x1794   :  { %v1479_v24 = vmul.f32 -1.442695, %v1315_v23 }
0x1795   :  { %1667 = vmatpush3.bf16.msra.mxu0 %v1666_v44 }
0x1796   :  { %1770 = vpow2.f32 %v1479_v24  ;;  %1668 = vmatprep.subr.bf16.mxu0 %v1830_v53 }
0x1799   :  { %1670 = vmatpush3.bf16.msra.mxu0 %v1669_v46 }
0x17a0   :  { %v1771_v34 = vpop.eup %1770 }
0x17a1   :  { %v1319_v27 = vadd.f32 1.0, %v1771_v34 }
0x17a3   :  { %1772 = vrcp.f32 %v1319_v27 }
0x17ad   :  { %v1773_v35 = vpop.eup %1772 }
0x17ae   :  { %v1322_v36 = vmul.f32 2.0, %v1773_v35  ;;  %v1324_v39 = vmul.f32 %v1773_v35, %v1226_v26 }
0x17b0   :  { %v1480_v58 = vadd.f32 -1.0, %v1322_v36 }
0x17b2   :  { %1326 = vrot.lane.b32.xlu0 %v1480_v58, %s1828_s26 }
0x1824   :  { %v1327_v37 = vpop.permute.xlu0 %1326 }
0x1825   :  { %v1329_v38 = vmul.f32 %v1773_v35, %v1327_v37 }
0x1827   :  { %1331 = vrot.lane.b32.xlu1 %v1329_v38, %s1829_s27 }
0x1899   :  { %v1332_v40 = vpop.permute.xlu1 %1331 }
0x189a   :  { %v1334_v41 = vadd.f32 %v1332_v40, %v1324_v39 }
0x189c   :  { %1774 = vtanh.f32 %v1334_v41 }
0x18a6   :  { %v1775_v47 = vpop.eup %1774 }
0x18a7   :  { %1337 = vrot.lane.b32.xlu0 %v1775_v47, %s1828_s26 }
0x1919   :  { %v1338_v48 = vpop.permute.xlu0 %1337 }
0x191a   :  { %v1340_v49 = vmul.f32 %v1773_v35, %v1338_v48 }
0x191c   :  { %1342 = vrot.lane.b32.xlu1 %v1340_v49, %s1829_s27 }
0x198e   :  { %v1343_v50 = vpop.permute.xlu1 %1342 }
0x198f   :  { %1519 = vmatmul.mubr.msk.f32.vlgmr.msra.gmra.mrb[16].mxu0 %vm295_vm2, %v1343_v50 }
0x1a62   :  { %v1412_v52 = vpop.f32.mrb[16].mxu0 }
0x1a63   :  { %v1413_v59 = vadd.f32 %v1412_v52, %v44_v51  ;;  %v1520_v0 = vpop.f32.mrb[17].mxu0 }
0x1a65   :  { %1416 = vst [vmem:[#allocation5] sm:$0xff] %v1413_v59 }
0x1a66   :  { %1809 = shalt.err (!%p1806_p12)
}
0x1a67   :  { %s1810_s16 = scalar_lea.hbm %s2121_s2, 128 }
0x1a68   :  { %p1811_p13 = scmp.ne.s32.totalorder %s2121_s2, %s1810_s16  ;;  %p1814_p0 = scmp.lt.u32.totalorder %s1810_s16, %s2121_s2 }
0x1a6a   :  { %p1816_p1 = pnand %p1814_p0, %p1811_p13 }
0x1a6c   :  { %1819 = shalt.err (!%p1816_p1)
}
0x1a6d   :  { %1426 = dma.vmem_to_hbm [thread:$0]  %s1424_s12, 128, %s2121_s2, [#allocation4]  }
0x1a6e   :  { %1822 = dma.done.wait [#allocation4], 128  }
0x1a6f   :  { %1823 = vsyncadd [#allocation4], 4294967168 }
0x1a70   :  { %1430 = vsyncpa [#allocation3], 1 }
0x1a71   :  { %1431 = vsyncpa [#allocation4], 1 }

</bundles_post_ra>
